<compile_context>
chip_gen: v6e
topology: v6e:2x2x1
jax: 0.10.0
libtpu: 0.0.40
codegen_flags: <defaults>
</compile_context>

<pallas_src>
import functools

import jax
import jax.numpy as jnp
import numpy as np
from jax import lax
from jax.experimental import pallas as pl
from jax.experimental.pallas import tpu as pltpu


# ----------------------------- Pallas kernel ------------------------------- #

def _dense_layer_kernel(x_ref, s1_ref, b1_ref, w1_ref, b2_ref, w2_ref, m_ref,
                        o_ref, stack_ref, *, W):
    """Fused DenseLayer forward for one batch-block (block_n images).

    x_ref    : (Cin,  L)        channels-first, batch folded into lanes, L = block_n*H*W
    s1/b1    : (Cin,  1)        folded inference-BN scale/shift for norm1
    w1_ref   : (Cmid, Cin)      conv1 (1x1) weight, transposed, norm2 scale folded in
    b2_ref   : (Cmid, 1)        norm2 shift
    w2_ref   : (Cout, 9*Cmid)   conv2 (3x3) weights fused over taps, col = tap*Cmid + ch
    m_ref    : (9,    L)        per-tap zero-padding masks (float 0/1)
    o_ref    : (Cout, L)        lane-dense store
    stack_ref: (9*Cmid, L)      VMEM scratch holding the 9 shifted/masked taps
    """
    Cmid = w1_ref.shape[0]
    L = x_ref.shape[1]

    # ---- norm1 (folded inference BN) + ReLU, channels-first (lane-dense) ----
    y = jnp.maximum(x_ref[...] * s1_ref[...] + b1_ref[...], 0.0)     # (Cin, L)

    # ---- conv1 (1x1): one MXU matmul; norm2 scale is folded into the weight,
    #      so only the shift + ReLU remain here ----
    h = jnp.dot(w1_ref[...], y, preferred_element_type=jnp.float32)  # (Cmid, L)
    h = jnp.maximum(h + b2_ref[...], 0.0)

    # ---- build the 9-tap stacked operand (9*Cmid, L), channels-first.
    # Tap (dy, dx) needs h at flat lane offset +((dy-1)*W + (dx-1)); realized as
    # a lane roll (XLU) + boundary mask (VPU). Masks also kill cross-image /
    # wrap-around lanes, so folding the batch into the lane axis is safe. ----
    for dy in range(3):
        for dx in range(3):
            t = dy * 3 + dx
            if dy == 1 and dx == 1:
                stack_ref[t * Cmid:(t + 1) * Cmid, :] = h
            else:
                shift = ((1 - dy) * W + (1 - dx)) % L   # roll[q] = h[q + off]
                shifted = pltpu.roll(h, shift, axis=1)
                stack_ref[t * Cmid:(t + 1) * Cmid, :] = shifted * m_ref[t:t + 1, :]

    # ---- conv2 (3x3, padding=1) as ONE fused matmul: (Cout, 9*Cmid)@(9*Cmid, L) ----
    o_ref[...] = jnp.dot(w2_ref[...], stack_ref[...],
                         preferred_element_type=jnp.float32)


# ------------------------------ wrapper (glue) ------------------------------ #

def dense_layer_forward(x_nchw, params, *, block_n=None):
    scale1, shift1, w1, scale2, shift2, w2_oihw = params
    N, Cin, H, W = x_nchw.shape
    Cmid = w1.shape[1]
    Cout = w2_oihw.shape[0]
    HW = H * W

    # Images per grid step (folded into the lane axis). Aim for >=512 lanes per
    # step on the single-TC chips; set block_n=1 to shard images across v7x TCs.
    if block_n is None:
        block_n = min(N, max(1, 512 // HW))
        while N % block_n:
            block_n -= 1
    assert N % block_n == 0
    L = block_n * HW
    grid = (N // block_n,)

    # Channels-first with the batch folded into lanes: (Cin, N*HW).
    x_cf = jnp.transpose(x_nchw, (1, 0, 2, 3)).reshape(Cin, N * HW)

    # conv1 weight pre-transposed with norm2's scale folded in: (Cmid, Cin).
    w1s = w1.T * scale2[:, None]

    # conv2 weights OIHW -> fused lane-dense (Cout, 9*Cmid); column t*Cmid + i
    # corresponds to tap t = ky*3 + kx, input channel i.
    w2f = jnp.transpose(w2_oihw, (0, 2, 3, 1)).reshape(Cout, 9 * Cmid)

    # Per-tap zero-padding masks for the 3x3 conv, replicated per image in the block.
    yy, xx = np.meshgrid(np.arange(H), np.arange(W), indexing="ij")
    masks_hw = np.empty((9, HW), np.float32)
    for dy in range(3):
        for dx in range(3):
            ok = ((yy + dy - 1 >= 0) & (yy + dy - 1 < H) &
                  (xx + dx - 1 >= 0) & (xx + dx - 1 < W))
            masks_hw[dy * 3 + dx] = ok.reshape(-1).astype(np.float32)
    masks = jnp.asarray(np.tile(masks_hw, (1, block_n)))              # (9, L)

    kernel = functools.partial(_dense_layer_kernel, W=W)

    out_cf = pl.pallas_call(
        kernel,
        out_shape=jax.ShapeDtypeStruct((Cout, N * HW), jnp.float32),
        grid=grid,
        in_specs=[
            pl.BlockSpec((Cin, L), lambda b: (0, b)),
            pl.BlockSpec((Cin, 1), lambda b: (0, 0)),
            pl.BlockSpec((Cin, 1), lambda b: (0, 0)),
            pl.BlockSpec((Cmid, Cin), lambda b: (0, 0)),
            pl.BlockSpec((Cmid, 1), lambda b: (0, 0)),
            pl.BlockSpec((Cout, 9 * Cmid), lambda b: (0, 0)),
            pl.BlockSpec((9, L), lambda b: (0, 0)),
        ],
        out_specs=pl.BlockSpec((Cout, L), lambda b: (0, b)),
        scratch_shapes=[pltpu.VMEM((9 * Cmid, L), jnp.float32)],
        compiler_params=pltpu.CompilerParams(
            dimension_semantics=("parallel",)),
    )(x_cf,
      scale1.reshape(Cin, 1), shift1.reshape(Cin, 1),
      w1s,
      shift2.reshape(Cmid, 1),
      w2f,
      masks)

    # (Cout, N*HW) -> (N, Cout, H, W)
    return jnp.transpose(out_cf.reshape(Cout, N, H, W), (1, 0, 2, 3))


# ------------------------- pure-JAX reference ------------------------------ #

def dense_layer_reference(x_nchw, params):
    scale1, shift1, w1, scale2, shift2, w2_oihw = params
    Cin, Cmid = w1.shape
    x = jnp.transpose(x_nchw, (0, 2, 3, 1))
    y = jnp.maximum(x * scale1 + shift1, 0.0)
    h = lax.conv_general_dilated(
        y, w1.reshape(1, 1, Cin, Cmid), (1, 1), 'VALID',
        dimension_numbers=('NHWC', 'HWIO', 'NHWC'))
    h = jnp.maximum(h * scale2 + shift2, 0.0)
    w2_hwio = jnp.transpose(w2_oihw, (2, 3, 1, 0))
    out = lax.conv_general_dilated(
        h, w2_hwio, (1, 1), 'SAME',
        dimension_numbers=('NHWC', 'HWIO', 'NHWC'))
    return jnp.transpose(out, (0, 3, 1, 2))


# ----------------------------------- main ---------------------------------- #

if __name__ == "__main__":
    # DenseLayer(num_input_features=8, growth_rate=8, bn_size=4)
    N, H, W = 2, 16, 16
    num_input_features, growth_rate, bn_size = 8, 8, 4
    Cin = num_input_features
    Cmid = bn_size * growth_rate          # conv1 out channels = 32
    Cout = growth_rate                    # conv2 out channels = 8
    eps = 1e-5

    key = jax.random.PRNGKey(0)
    ks = jax.random.split(key, 11)

    x = jax.random.normal(ks[0], (N, Cin, H, W), jnp.float32)

    # norm1 params (BatchNormAct2d, inference mode): fold into scale/shift
    g1 = jax.random.uniform(ks[1], (Cin,), jnp.float32, 0.5, 1.5)
    b1 = 0.1 * jax.random.normal(ks[2], (Cin,), jnp.float32)
    m1 = 0.1 * jax.random.normal(ks[3], (Cin,), jnp.float32)
    v1 = jax.random.uniform(ks[4], (Cin,), jnp.float32, 0.5, 1.5)
    scale1 = g1 / jnp.sqrt(v1 + eps)
    shift1 = b1 - m1 * scale1

    # norm2 params
    g2 = jax.random.uniform(ks[5], (Cmid,), jnp.float32, 0.5, 1.5)
    b2 = 0.1 * jax.random.normal(ks[6], (Cmid,), jnp.float32)
    m2 = 0.1 * jax.random.normal(ks[7], (Cmid,), jnp.float32)
    v2 = jax.random.uniform(ks[8], (Cmid,), jnp.float32, 0.5, 1.5)
    scale2 = g2 / jnp.sqrt(v2 + eps)
    shift2 = b2 - m2 * scale2

    # conv1 weight (PyTorch (Cmid, Cin, 1, 1), stored here as (Cin, Cmid))
    w1 = jax.random.normal(ks[9], (Cin, Cmid), jnp.float32) / np.sqrt(Cin)
    # conv2 weight in PyTorch OIHW layout (Cout, Cmid, 3, 3)
    w2_oihw = (jax.random.normal(ks[10], (Cout, Cmid, 3, 3), jnp.float32)
               / np.sqrt(Cmid * 9))

    params = (scale1, shift1, w1, scale2, shift2, w2_oihw)

    out = jax.block_until_ready(dense_layer_forward(x, params))
    ref = jax.block_until_ready(dense_layer_reference(x, params))

    assert out.shape == (N, Cout, H, W), out.shape
    np.testing.assert_allclose(np.asarray(out), np.asarray(ref),
                               rtol=5e-4, atol=5e-4)
    print("KERNEL_OK")
</pallas_src>

<mosaic_0001>
module attributes {stable_mosaic.version = 11 : i64} {
  func.func @_dense_layer_kernel(%arg0: i32, %arg1: memref<8x512xf32, #tpu.memory_space<vmem>>, %arg2: memref<8x1xf32, #tpu.memory_space<vmem>>, %arg3: memref<8x1xf32, #tpu.memory_space<vmem>>, %arg4: memref<32x8xf32, #tpu.memory_space<vmem>>, %arg5: memref<32x1xf32, #tpu.memory_space<vmem>>, %arg6: memref<8x288xf32, #tpu.memory_space<vmem>>, %arg7: memref<9x512xf32, #tpu.memory_space<vmem>>, %arg8: memref<8x512xf32, #tpu.memory_space<vmem>>, %arg9: memref<288x512xf32, #tpu.memory_space<vmem>>) attributes {dimension_semantics = [#tpu.dimension_semantics<parallel>], iteration_bounds = array<i64: 1>, scalar_prefetch = 0 : i64, scratch_operands = 1 : i64, tpu.core_type = #tpu.core_type<tc>, window_params = [{transform_indices = @transform_0, window_bounds = array<i64: 8, 512>}, {pipeline_mode = #tpu.pipeline_mode<synchronous>, transform_indices = @transform_1, window_bounds = array<i64: 8, 1>}, {pipeline_mode = #tpu.pipeline_mode<synchronous>, transform_indices = @transform_2, window_bounds = array<i64: 8, 1>}, {pipeline_mode = #tpu.pipeline_mode<synchronous>, transform_indices = @transform_3, window_bounds = array<i64: 32, 8>}, {pipeline_mode = #tpu.pipeline_mode<synchronous>, transform_indices = @transform_4, window_bounds = array<i64: 32, 1>}, {pipeline_mode = #tpu.pipeline_mode<synchronous>, transform_indices = @transform_5, window_bounds = array<i64: 8, 288>}, {pipeline_mode = #tpu.pipeline_mode<synchronous>, transform_indices = @transform_6, window_bounds = array<i64: 9, 512>}, {transform_indices = @transform_7, window_bounds = array<i64: 8, 512>}]} {
    %c0 = arith.constant 0 : index
    %c0_0 = arith.constant 0 : index
    %0 = vector.load %arg1[%c0, %c0_0] : memref<8x512xf32, #tpu.memory_space<vmem>>, vector<8x512xf32>
    %c0_1 = arith.constant 0 : index
    %c0_2 = arith.constant 0 : index
    %1 = vector.load %arg2[%c0_1, %c0_2] : memref<8x1xf32, #tpu.memory_space<vmem>>, vector<8x1xf32>
    %2 = vector.broadcast %1 : vector<8x1xf32> to vector<8x512xf32>
    %3 = arith.mulf %0, %2 : vector<8x512xf32>
    %c0_3 = arith.constant 0 : index
    %c0_4 = arith.constant 0 : index
    %4 = vector.load %arg3[%c0_3, %c0_4] : memref<8x1xf32, #tpu.memory_space<vmem>>, vector<8x1xf32>
    %5 = vector.broadcast %4 : vector<8x1xf32> to vector<8x512xf32>
    %6 = arith.addf %3, %5 : vector<8x512xf32>
    %cst = arith.constant 0.000000e+00 : f32
    %7 = vector.broadcast %cst : f32 to vector<8x512xf32>
    %8 = arith.maximumf %6, %7 : vector<8x512xf32>
    %c0_5 = arith.constant 0 : index
    %c0_6 = arith.constant 0 : index
    %9 = vector.load %arg4[%c0_5, %c0_6] : memref<32x8xf32, #tpu.memory_space<vmem>>, vector<32x8xf32>
    %cst_7 = arith.constant dense<0.000000e+00> : vector<32x512xf32>
    %10 = tpu.matmul %9, %8, %cst_7 {dimension_numbers = #tpu.dot_dimension_numbers<[1], [0], [0], [1], [0, 0, 1, 1], [], []>} : vector<32x8xf32>, vector<8x512xf32>, vector<32x512xf32> -> vector<32x512xf32>
    %c0_8 = arith.constant 0 : index
    %c0_9 = arith.constant 0 : index
    %11 = vector.load %arg5[%c0_8, %c0_9] : memref<32x1xf32, #tpu.memory_space<vmem>>, vector<32x1xf32>
    %12 = vector.broadcast %11 : vector<32x1xf32> to vector<32x512xf32>
    %13 = arith.addf %10, %12 : vector<32x512xf32>
    %cst_10 = arith.constant 0.000000e+00 : f32
    %14 = vector.broadcast %cst_10 : f32 to vector<32x512xf32>
    %15 = arith.maximumf %13, %14 : vector<32x512xf32>
    %c17_i32 = arith.constant 17 : i32
    %16 = tpu.dynamic_rotate %15 by %c17_i32 dim 1 : vector<32x512xf32>, i32 -> vector<32x512xf32>
    %c0_11 = arith.constant 0 : index
    %c0_12 = arith.constant 0 : index
    %17 = vector.load %arg7[%c0_11, %c0_12] : memref<9x512xf32, #tpu.memory_space<vmem>>, vector<1x512xf32>
    %18 = vector.broadcast %17 : vector<1x512xf32> to vector<32x512xf32>
    %19 = arith.mulf %16, %18 : vector<32x512xf32>
    %c0_13 = arith.constant 0 : index
    %c0_14 = arith.constant 0 : index
    %20 = vector.load %arg9[%c0_13, %c0_14] : memref<288x512xf32, #tpu.memory_space<vmem>>, vector<32x512xf32>
    tpu.vector_store %arg9[%c0_13, %c0_14], %19 {strides = array<i32>} : memref<288x512xf32, #tpu.memory_space<vmem>>, vector<32x512xf32>,
    %c16_i32 = arith.constant 16 : i32
    %21 = tpu.dynamic_rotate %15 by %c16_i32 dim 1 : vector<32x512xf32>, i32 -> vector<32x512xf32>
    %c1 = arith.constant 1 : index
    %c0_15 = arith.constant 0 : index
    %22 = vector.load %arg7[%c1, %c0_15] : memref<9x512xf32, #tpu.memory_space<vmem>>, vector<1x512xf32>
    %23 = vector.broadcast %22 : vector<1x512xf32> to vector<32x512xf32>
    %24 = arith.mulf %21, %23 : vector<32x512xf32>
    %c32 = arith.constant 32 : index
    %c0_16 = arith.constant 0 : index
    %25 = vector.load %arg9[%c32, %c0_16] : memref<288x512xf32, #tpu.memory_space<vmem>>, vector<32x512xf32>
    tpu.vector_store %arg9[%c32, %c0_16], %24 {strides = array<i32>} : memref<288x512xf32, #tpu.memory_space<vmem>>, vector<32x512xf32>,
    %c15_i32 = arith.constant 15 : i32
    %26 = tpu.dynamic_rotate %15 by %c15_i32 dim 1 : vector<32x512xf32>, i32 -> vector<32x512xf32>
    %c2 = arith.constant 2 : index
    %c0_17 = arith.constant 0 : index
    %27 = vector.load %arg7[%c2, %c0_17] : memref<9x512xf32, #tpu.memory_space<vmem>>, vector<1x512xf32>
    %28 = vector.broadcast %27 : vector<1x512xf32> to vector<32x512xf32>
    %29 = arith.mulf %26, %28 : vector<32x512xf32>
    %c64 = arith.constant 64 : index
    %c0_18 = arith.constant 0 : index
    %30 = vector.load %arg9[%c64, %c0_18] : memref<288x512xf32, #tpu.memory_space<vmem>>, vector<32x512xf32>
    tpu.vector_store %arg9[%c64, %c0_18], %29 {strides = array<i32>} : memref<288x512xf32, #tpu.memory_space<vmem>>, vector<32x512xf32>,
    %c1_i32 = arith.constant 1 : i32
    %31 = tpu.dynamic_rotate %15 by %c1_i32 dim 1 : vector<32x512xf32>, i32 -> vector<32x512xf32>
    %c3 = arith.constant 3 : index
    %c0_19 = arith.constant 0 : index
    %32 = vector.load %arg7[%c3, %c0_19] : memref<9x512xf32, #tpu.memory_space<vmem>>, vector<1x512xf32>
    %33 = vector.broadcast %32 : vector<1x512xf32> to vector<32x512xf32>
    %34 = arith.mulf %31, %33 : vector<32x512xf32>
    %c96 = arith.constant 96 : index
    %c0_20 = arith.constant 0 : index
    %35 = vector.load %arg9[%c96, %c0_20] : memref<288x512xf32, #tpu.memory_space<vmem>>, vector<32x512xf32>
    tpu.vector_store %arg9[%c96, %c0_20], %34 {strides = array<i32>} : memref<288x512xf32, #tpu.memory_space<vmem>>, vector<32x512xf32>,
    %c128 = arith.constant 128 : index
    %c0_21 = arith.constant 0 : index
    %36 = vector.load %arg9[%c128, %c0_21] : memref<288x512xf32, #tpu.memory_space<vmem>>, vector<32x512xf32>
    tpu.vector_store %arg9[%c128, %c0_21], %15 {strides = array<i32>} : memref<288x512xf32, #tpu.memory_space<vmem>>, vector<32x512xf32>,
    %c511_i32 = arith.constant 511 : i32
    %37 = tpu.dynamic_rotate %15 by %c511_i32 dim 1 : vector<32x512xf32>, i32 -> vector<32x512xf32>
    %c5 = arith.constant 5 : index
    %c0_22 = arith.constant 0 : index
    %38 = vector.load %arg7[%c5, %c0_22] : memref<9x512xf32, #tpu.memory_space<vmem>>, vector<1x512xf32>
    %39 = vector.broadcast %38 : vector<1x512xf32> to vector<32x512xf32>
    %40 = arith.mulf %37, %39 : vector<32x512xf32>
    %c160 = arith.constant 160 : index
    %c0_23 = arith.constant 0 : index
    %41 = vector.load %arg9[%c160, %c0_23] : memref<288x512xf32, #tpu.memory_space<vmem>>, vector<32x512xf32>
    tpu.vector_store %arg9[%c160, %c0_23], %40 {strides = array<i32>} : memref<288x512xf32, #tpu.memory_space<vmem>>, vector<32x512xf32>,
    %c497_i32 = arith.constant 497 : i32
    %42 = tpu.dynamic_rotate %15 by %c497_i32 dim 1 : vector<32x512xf32>, i32 -> vector<32x512xf32>
    %c6 = arith.constant 6 : index
    %c0_24 = arith.constant 0 : index
    %43 = vector.load %arg7[%c6, %c0_24] : memref<9x512xf32, #tpu.memory_space<vmem>>, vector<1x512xf32>
    %44 = vector.broadcast %43 : vector<1x512xf32> to vector<32x512xf32>
    %45 = arith.mulf %42, %44 : vector<32x512xf32>
    %c192 = arith.constant 192 : index
    %c0_25 = arith.constant 0 : index
    %46 = vector.load %arg9[%c192, %c0_25] : memref<288x512xf32, #tpu.memory_space<vmem>>, vector<32x512xf32>
    tpu.vector_store %arg9[%c192, %c0_25], %45 {strides = array<i32>} : memref<288x512xf32, #tpu.memory_space<vmem>>, vector<32x512xf32>,
    %c496_i32 = arith.constant 496 : i32
    %47 = tpu.dynamic_rotate %15 by %c496_i32 dim 1 : vector<32x512xf32>, i32 -> vector<32x512xf32>
    %c7 = arith.constant 7 : index
    %c0_26 = arith.constant 0 : index
    %48 = vector.load %arg7[%c7, %c0_26] : memref<9x512xf32, #tpu.memory_space<vmem>>, vector<1x512xf32>
    %49 = vector.broadcast %48 : vector<1x512xf32> to vector<32x512xf32>
    %50 = arith.mulf %47, %49 : vector<32x512xf32>
    %c224 = arith.constant 224 : index
    %c0_27 = arith.constant 0 : index
    %51 = vector.load %arg9[%c224, %c0_27] : memref<288x512xf32, #tpu.memory_space<vmem>>, vector<32x512xf32>
    tpu.vector_store %arg9[%c224, %c0_27], %50 {strides = array<i32>} : memref<288x512xf32, #tpu.memory_space<vmem>>, vector<32x512xf32>,
    %c495_i32 = arith.constant 495 : i32
    %52 = tpu.dynamic_rotate %15 by %c495_i32 dim 1 : vector<32x512xf32>, i32 -> vector<32x512xf32>
    %c8 = arith.constant 8 : index
    %c0_28 = arith.constant 0 : index
    %53 = vector.load %arg7[%c8, %c0_28] : memref<9x512xf32, #tpu.memory_space<vmem>>, vector<1x512xf32>
    %54 = vector.broadcast %53 : vector<1x512xf32> to vector<32x512xf32>
    %55 = arith.mulf %52, %54 : vector<32x512xf32>
    %c256 = arith.constant 256 : index
    %c0_29 = arith.constant 0 : index
    %56 = vector.load %arg9[%c256, %c0_29] : memref<288x512xf32, #tpu.memory_space<vmem>>, vector<32x512xf32>
    tpu.vector_store %arg9[%c256, %c0_29], %55 {strides = array<i32>} : memref<288x512xf32, #tpu.memory_space<vmem>>, vector<32x512xf32>,
    %c0_30 = arith.constant 0 : index
    %c0_31 = arith.constant 0 : index
    %57 = vector.load %arg6[%c0_30, %c0_31] : memref<8x288xf32, #tpu.memory_space<vmem>>, vector<8x288xf32>
    %c0_32 = arith.constant 0 : index
    %c0_33 = arith.constant 0 : index
    %58 = vector.load %arg9[%c0_32, %c0_33] : memref<288x512xf32, #tpu.memory_space<vmem>>, vector<288x512xf32>
    %cst_34 = arith.constant dense<0.000000e+00> : vector<8x512xf32>
    %59 = tpu.matmul %57, %58, %cst_34 {dimension_numbers = #tpu.dot_dimension_numbers<[1], [0], [0], [1], [0, 0, 1, 1], [], []>} : vector<8x288xf32>, vector<288x512xf32>, vector<8x512xf32> -> vector<8x512xf32>
    %c0_35 = arith.constant 0 : index
    %c0_36 = arith.constant 0 : index
    %60 = vector.load %arg8[%c0_35, %c0_36] : memref<8x512xf32, #tpu.memory_space<vmem>>, vector<8x512xf32>
    tpu.vector_store %arg8[%c0_35, %c0_36], %59 {strides = array<i32>} : memref<8x512xf32, #tpu.memory_space<vmem>>, vector<8x512xf32>,
    return
  }
  func.func @transform_0(%arg0: i32) -> (i32, i32) {
    %c0_i32 = arith.constant 0 : i32
    %c0_i32_0 = arith.constant 0 : i32
    return %c0_i32, %arg0 : i32, i32
  }
  func.func @transform_1(%arg0: i32) -> (i32, i32) {
    %c0_i32 = arith.constant 0 : i32
    %c0_i32_0 = arith.constant 0 : i32
    %c0_i32_1 = arith.constant 0 : i32
    return %c0_i32, %c0_i32_0 : i32, i32
  }
  func.func @transform_2(%arg0: i32) -> (i32, i32) {
    %c0_i32 = arith.constant 0 : i32
    %c0_i32_0 = arith.constant 0 : i32
    %c0_i32_1 = arith.constant 0 : i32
    return %c0_i32, %c0_i32_0 : i32, i32
  }
  func.func @transform_3(%arg0: i32) -> (i32, i32) {
    %c0_i32 = arith.constant 0 : i32
    %c0_i32_0 = arith.constant 0 : i32
    %c0_i32_1 = arith.constant 0 : i32
    return %c0_i32, %c0_i32_0 : i32, i32
  }
  func.func @transform_4(%arg0: i32) -> (i32, i32) {
    %c0_i32 = arith.constant 0 : i32
    %c0_i32_0 = arith.constant 0 : i32
    %c0_i32_1 = arith.constant 0 : i32
    return %c0_i32, %c0_i32_0 : i32, i32
  }
  func.func @transform_5(%arg0: i32) -> (i32, i32) {
    %c0_i32 = arith.constant 0 : i32
    %c0_i32_0 = arith.constant 0 : i32
    %c0_i32_1 = arith.constant 0 : i32
    return %c0_i32, %c0_i32_0 : i32, i32
  }
  func.func @transform_6(%arg0: i32) -> (i32, i32) {
    %c0_i32 = arith.constant 0 : i32
    %c0_i32_0 = arith.constant 0 : i32
    %c0_i32_1 = arith.constant 0 : i32
    return %c0_i32, %c0_i32_0 : i32, i32
  }
  func.func @transform_7(%arg0: i32) -> (i32, i32) {
    %c0_i32 = arith.constant 0 : i32
    %c0_i32_0 = arith.constant 0 : i32
    return %c0_i32, %arg0 : i32, i32
  }
}

</mosaic_0001>

<bundles_post_ra>
// kernel: tpu_custom_call.1
= control target key start
LH: loop header
LB: loop body
LE: loop exit
PB: predicated region body
PF: predicated region fallthrough
CT: control target
= control target key end

     0   :  { %12 = vsyncpa [#allocation4], 0  ;;  %s3118_s0 = inlined_call_operand.vmem [shape: f32[8,512], index: 0, kind: input, shape index: {}]   ;;  %s3119_s1 = inlined_call_operand.vmem [shape: f32[8,1], index: 1, kind: input, shape index: {}]   ;;  %s3120_s2 = inlined_call_operand.vmem [shape: f32[8,1], index: 2, kind: input, shape index: {}]   ;;  %s3121_s3 = inlined_call_operand.vmem [shape: f32[32,8], index: 3, kind: input, shape index: {}]   ;;  %s3122_s4 = inlined_call_operand.vmem [shape: f32[32,1], index: 4, kind: input, shape index: {}]   ;;  %s3123_s5 = inlined_call_operand.hbm [shape: f32[8,288], index: 5, kind: input, shape index: {}]   ;;  %s3124_s6 = inlined_call_operand.vmem [shape: f32[9,512], index: 6, kind: input, shape index: {}]   ;;  %s3125_s7 = inlined_call_operand.hbm [shape: f32[8,512], index: 7, kind: output, shape index: {}]  }
   0x1   :  { %13 = vsyncpa [#allocation5], 0  ;;  %s1680_s24 = smov [#allocation3]  }
   0x2   :  { %s30_s25 = sshll.u32 %s1680_s24, 4  ;;  %s31_s25 = int_to_ptr.vmem [resolvable:$true] %s30_s25 }
   0x3   :  { %s1644_s26 = scalar_lea.vmem %s31_s25, 384  ;;  %p1649_p1 = scmp.lt.s32.totalorder %s31_s25, %s31_s25 }
   0x4   :  { %p1645_p0 = scmp.ne.s32.totalorder %s31_s25, %s1644_s26  ;;  %p1650_p2 = scmp.lt.s32.totalorder %s1644_s26, %s1644_s26 }
   0x6   :  { %p1651_p3 = por %p1650_p2, %p1649_p1 }
   0x8   :  { %p1652_p4 = pnand %p1651_p3, %p1645_p0 }
   0xa   :  { %1655 = shalt.err (!%p1652_p4)
}
   0xb   :  { %33 = dma.hbm_to_vmem [thread:$0]  %s3123_s5, 384, %s31_s25, [#allocation4]  }
   0xc   :  { %1676 = dma.done.wait [#allocation4], 384  }
   0xd   :  { %1677 = vsyncadd [#allocation4], 4294966912  ;;  %v1681_v0 = vmov 0   ;;  %v43_v1 = vld [vmem:[%s3119_s1] sm:$0xff]  ;;  %v72_v3 = vld [vmem:[%s3122_s4 + $0x8] sm:$0xff]  ;;  %v3126_v4 = vmov 0.0  }
   0xe   :  { %1634 = vset.pattern.permute.xlu0 %v1681_v0  ;;  %1635 = vset.pattern.permute.xlu1 %v1681_v0  ;;  %v53_v2 = vld [vmem:[%s3120_s2] sm:$0xff]  ;;  %v74_v5 = vld [vmem:[%s3122_s4 + $0x18] sm:$0xff]  ;;  %v73_v6 = vld [vmem:[%s3122_s4 + $0x10] sm:$0xff]  ;;  %vm95_vm0 = vcmask 64512   ;;  %s1684_s29 = smov 1   ;;  %s1685_s30 = smov 15  }
   0xf   :  { %46 = vperm.xlu0 %1634, %v43_v1   ;;  %172 = vmatprep.mubr.f32.mxu0 %v3126_v4  ;;  %v71_v7 = vld [vmem:[%s3122_s4] sm:$0xff]  ;;  %v40_v8 = vld [vmem:[%s3118_s0 + $0x8] sm:$0xff]  ;;  %v42_v10 = vld [vmem:[%s3118_s0 + $0x18] sm:$0xff]  ;;  %s1686_s8 = smov 112   ;;  %s1687_s9 = smov 16   ;;  %vm1298_vm7 = vcmask 261120  }
  0x10   :  { %261 = vmatprep.mubr.f32.mxu1 %v3126_v4  ;;  %92 = vperm.xlu1 %1635, %v74_v5   ;;  %v39_v11 = vld [vmem:[%s3118_s0] sm:$0xff]  ;;  %v41_v12 = vld [vmem:[%s3118_s0 + $0x10] sm:$0xff]  ;;  %v68_v27 = vld [vmem:[%s3121_s3 + $0x8] sm:$0xff]  ;;  %s1688_s10 = smov 17   ;;  %s1689_s11 = smov 113  }
  0x11   :  { %v67_v26 = vld [vmem:[%s3121_s3] sm:$0xff]  ;;  %v69_v28 = vld [vmem:[%s3121_s3 + $0x10] sm:$0xff]  ;;  %v70_v29 = vld [vmem:[%s3121_s3 + $0x18] sm:$0xff]  ;;  %s1683_s3 = smov 111   ;;  %s1690_s5 = smov 127  }
  0x13   :  { %56 = vperm.xlu0 %1634, %v53_v2  }
  0x14   :  { %87 = vperm.xlu1 %1635, %v73_v6  }
  0x17   :  { %82 = vperm.xlu0 %1634, %v72_v3  }
  0x18   :  { %77 = vperm.xlu1 %1635, %v71_v7  }
  0x8a   :  { %v47_v9 = vpop.permute.xlu0 %46 }
  0x8b   :  { %v50_v13 = vmul.f32 %v47_v9, %v40_v8  ;;  %v52_v14 = vmul.f32 %v47_v9, %v42_v10  ;;  %v49_v15 = vmul.f32 %v47_v9, %v39_v11  ;;  %v51_v16 = vmul.f32 %v47_v9, %v41_v12  ;;  %v1794_v30 = vpop.permute.xlu1 %92 }
  0x8e   :  { %v57_v17 = vpop.permute.xlu0 %56 }
  0x8f   :  { %v60_v18 = vadd.f32 %v57_v17, %v50_v13  ;;  %v62_v19 = vadd.f32 %v57_v17, %v52_v14  ;;  %v59_v20 = vadd.f32 %v57_v17, %v49_v15  ;;  %v61_v21 = vadd.f32 %v57_v17, %v51_v16  ;;  %v1796_v31 = vpop.permute.xlu1 %87 }
  0x91   :  { %v64_v22 = vmax.f32 %v60_v18, 0.0  ;;  %v66_v23 = vmax.f32 %v62_v19, 0.0  ;;  %v63_v24 = vmax.f32 %v59_v20, 0.0  ;;  %v65_v25 = vmax.f32 %v61_v21, 0.0 }
  0x92   :  { %v83_v47 = vpop.permute.xlu0 %82 }
  0x93   :  { %138 = vmatprep.subr.mxu0 %v64_v22  ;;  %227 = vmatprep.subr.mxu1 %v66_v23  ;;  %v78_v32 = vpop.permute.xlu1 %77 }
  0x94   :  { %139 = vmatpush1.msra.mxu0 %v63_v24  ;;  %228 = vmatpush1.msra.mxu1 %v65_v25 }
  0x95   :  { %1605 = vmatmul.mubr.msk.f32.vlgmr.msra.gmra.mxu0 %vm95_vm0, %v67_v26  ;;  %1609 = vmatmul.mubr.msk.f32.vlgmr.msra.gmra.mxu1 %vm95_vm0, %v67_v26 }
  0x96   :  { %178 = vmatprep.mubr.f32.mxu0 %v3126_v4  ;;  %267 = vmatprep.mubr.f32.mxu1 %v3126_v4 }
  0x99   :  { %1606 = vmatmul.mubr.msk.f32.gmra.mxu0 %vm95_vm0, %v68_v27  ;;  %1610 = vmatmul.mubr.msk.f32.gmra.mxu1 %vm95_vm0, %v68_v27 }
  0x9a   :  { %184 = vmatprep.mubr.f32.mxu0 %v3126_v4  ;;  %273 = vmatprep.mubr.f32.mxu1 %v3126_v4 }
  0x9d   :  { %1607 = vmatmul.mubr.msk.f32.gmra.mxu0 %vm95_vm0, %v69_v28  ;;  %1611 = vmatmul.mubr.msk.f32.gmra.mxu1 %vm95_vm0, %v69_v28 }
  0x9e   :  { %190 = vmatprep.mubr.f32.mxu0 %v3126_v4  ;;  %279 = vmatprep.mubr.f32.mxu1 %v3126_v4 }
  0xa1   :  { %1608 = vmatmul.mubr.msk.f32.gmra.mxu0 %vm95_vm0, %v70_v29  ;;  %1612 = vmatmul.mubr.msk.f32.gmra.mxu1 %vm95_vm0, %v70_v29 }
  0xa2   :  { %1437 = vmatprep.mubr.f32.mxu1 %v3126_v4 }
 0x155   :  { %v174_v33 = vpop.f32.mrf.mxu0  ;;  %v263_v34 = vpop.f32.mrf.mxu1 }
 0x156   :  { %v175_v35 = vadd.f32 %v174_v33, %v78_v32  ;;  %v264_v36 = vadd.f32 %v263_v34, %v78_v32 }
 0x157   :  { %v176_v39 = vpop.f32.mrf.mxu0  ;;  %v265_v42 = vpop.f32.mrf.mxu1 }
 0x158   :  { %v1798_v37 = vmax.f32 %v175_v35, 0.0  ;;  %v1800_v38 = vmax.f32 %v264_v36, 0.0  ;;  %v177_v40 = vadd.f32 %v176_v39, %v78_v32  ;;  %v266_v43 = vadd.f32 %v265_v42, %v78_v32 }
 0x159   :  { %v180_v45 = vpop.f32.mrf.mxu0  ;;  %v269_v46 = vpop.f32.mrf.mxu1 }
 0x15a   :  { %3196 = vst [vmem:[#allocation9_spill] sm:$0xff] %v1798_v37  ;;  %3197 = vst [vmem:[#allocation10_spill] sm:$0xff] %v1800_v38  ;;  %1063 = vrot.lane.b32.xlu1 %v1800_v38, %s1683_s3  ;;  %615 = vrot.lane.b32.xlu0 %v1798_v37, %s1684_s29  ;;  %v1814_v41 = vmax.f32 %v177_v40, 0.0  ;;  %v1824_v44 = vmax.f32 %v266_v43, 0.0  ;;  %v181_v48 = vadd.f32 %v180_v45, %v83_v47 }
 0x15b   :  { %v270_v49 = vadd.f32 %v269_v46, %v83_v47  ;;  %v182_v52 = vpop.f32.mrf.mxu0  ;;  %v271_v55 = vpop.f32.mrf.mxu1 }
 0x15c   :  { %3198 = vst [vmem:[#allocation11_spill] sm:$0xff] %v1814_v41  ;;  %3199 = vst [vmem:[#allocation12_spill] sm:$0xff] %v1824_v44  ;;  %v1850_v50 = vmax.f32 %v181_v48, 0.0  ;;  %v183_v53 = vadd.f32 %v182_v52, %v83_v47  ;;  %v272_v56 = vadd.f32 %v271_v55, %v83_v47 }
 0x15d   :  { %v1852_v51 = vmax.f32 %v270_v49, 0.0  ;;  %v186_v58 = vpop.f32.mrf.mxu0  ;;  %v275_v59 = vpop.f32.mrf.mxu1 }
 0x15e   :  { %1047 = vrot.lane.b32.xlu1 %v1798_v37, %s1683_s3  ;;  %511 = vrot.lane.b32.xlu0 %v1798_v37, %s1685_s30  ;;  %3200 = vst [vmem:[#allocation13_spill] sm:$0xff] %v1850_v50  ;;  %v1870_v54 = vmax.f32 %v183_v53, 0.0  ;;  %v1880_v57 = vmax.f32 %v272_v56, 0.0  ;;  %v187_v60 = vadd.f32 %v186_v58, %v1796_v31  ;;  %v276_v61 = vadd.f32 %v275_v59, %v1796_v31 }
 0x15f   :  { %3201 = vst [vmem:[#allocation14_spill] sm:$0xff] %v1852_v51  ;;  %v188_v0 = vpop.f32.mrf.mxu0  ;;  %v277_v3 = vpop.f32.mrf.mxu1  ;;  %v3127_v53 = vlaneseq }
 0x160   :  { %3202 = vst [vmem:[#allocation15_spill] sm:$0xff] %v1870_v54  ;;  %3203 = vst [vmem:[#allocation16_spill] sm:$0xff] %v1880_v57  ;;  %v1908_v62 = vmax.f32 %v187_v60, 0.0  ;;  %v1910_v63 = vmax.f32 %v276_v61, 0.0  ;;  %v189_v1 = vadd.f32 %v188_v0, %v1796_v31  ;;  %v278_v5 = vadd.f32 %v277_v3, %v1796_v31 }
 0x161   :  { %v192_v19 = vpop.f32.mrf.mxu0  ;;  %v281_v20 = vpop.f32.mrf.mxu1  ;;  %v2074_v59 = vand.u32 127, %v3127_v53 }
 0x162   :  { %943 = vrot.lane.b32.xlu1 %v1798_v37, %s1686_s8  ;;  %631 = vrot.lane.b32.xlu0 %v1800_v38, %s1684_s29  ;;  %3204 = vst [vmem:[#allocation17_spill] sm:$0xff] %v1908_v62  ;;  %3205 = vst [vmem:[#allocation18_spill] sm:$0xff] %v1910_v63  ;;  %v1933_v2 = vmax.f32 %v189_v1, 0.0  ;;  %v1948_v8 = vmax.f32 %v278_v5, 0.0  ;;  %v193_v21 = vadd.f32 %v192_v19, %v1794_v30 }
 0x163   :  { %v282_v22 = vadd.f32 %v281_v20, %v1794_v30  ;;  %v194_v36 = vpop.f32.mrf.mxu0  ;;  %v283_v58 = vpop.f32.mrf.mxu1  ;;  %vm543_vm1 = vcmp.lt.s32.totalorder %v2074_v59, 15  ;;  %vm439_vm2 = vcmp.lt.s32.totalorder %v2074_v59, 16  ;;  %vm336_vm3 = vcmp.lt.s32.totalorder %v2074_v59, 17 }
 0x164   :  { %3206 = vst [vmem:[#allocation19_spill] sm:$0xff] %v1933_v2  ;;  %3207 = vst [vmem:[#allocation20_spill] sm:$0xff] %v1948_v8  ;;  %v2000_v25 = vmax.f32 %v193_v21, 0.0  ;;  %v195_v39 = vadd.f32 %v194_v36, %v1794_v30  ;;  %v284_v60 = vadd.f32 %v283_v58, %v1794_v30  ;;  %vm647_vm4 = vcmp.lt.s32.totalorder %v2074_v59, 1 }
 0x165   :  { %v2002_v26 = vmax.f32 %v282_v22, 0.0  ;;  %vm975_vm5 = vcmp.lt.s32.totalorder %v2074_v59, 112  ;;  %vm1079_vm6 = vcmp.lt.s32.totalorder %v2074_v59, 111  ;;  %vm871_vm8 = vcmp.lt.s32.totalorder %v2074_v59, 113 }
 0x166   :  { %623 = vrot.lane.b32.xlu1 %v1814_v41, %s1684_s29  ;;  %407 = vrot.lane.b32.xlu0 %v1798_v37, %s1687_s9  ;;  %3211 = vst [vmem:[#allocation24_spill] sm:$0xff] %v2000_v25  ;;  %v2045_v43 = vmax.f32 %v195_v39, 0.0  ;;  %v2093_v3 = vmax.f32 %v284_v60, 0.0  ;;  %vm767_vm9 = vcmp.lt.s32.totalorder %v2074_v59, 127  ;;  %v3380_v59 = vld [vmem:[#allocation10_spill] sm:$0xff] }
 0x167   :  { %3212 = vst [vmem:[#allocation25_spill] sm:$0xff] %v2002_v26 }
 0x168   :  { %3216 = vst [vmem:[#allocation29_spill] sm:$0xff] %v2045_v43  ;;  %3224 = vst [vmem:[#allocation37_spill] sm:$0xff] %v2093_v3 }
 0x16a   :  { %519 = vrot.lane.b32.xlu1 %v1814_v41, %s1685_s30  ;;  %527 = vrot.lane.b32.xlu0 %v1800_v38, %s1685_s30 }
 0x16e   :  { %535 = vrot.lane.b32.xlu1 %v1824_v44, %s1685_s30  ;;  %302 = vrot.lane.b32.xlu0 %v1798_v37, %s1688_s10 }
 0x172   :  { %415 = vrot.lane.b32.xlu1 %v1814_v41, %s1687_s9  ;;  %423 = vrot.lane.b32.xlu0 %v1800_v38, %s1687_s9 }
 0x176   :  { %431 = vrot.lane.b32.xlu1 %v1824_v44, %s1687_s9  ;;  %318 = vrot.lane.b32.xlu0 %v1800_v38, %s1688_s10 }
 0x17a   :  { %310 = vrot.lane.b32.xlu1 %v1814_v41, %s1688_s10  ;;  %959 = vrot.lane.b32.xlu0 %v1800_v38, %s1686_s8 }
 0x17e   :  { %326 = vrot.lane.b32.xlu1 %v1824_v44, %s1688_s10  ;;  %1055 = vrot.lane.b32.xlu0 %v1814_v41, %s1683_s3 }
 0x182   :  { %951 = vrot.lane.b32.xlu1 %v1814_v41, %s1686_s8  ;;  %639 = vrot.lane.b32.xlu0 %v1824_v44, %s1684_s29 }
 0x186   :  { %1065 = vrot.lane.b32.xlu1 %v1852_v51, %s1683_s3  ;;  %617 = vrot.lane.b32.xlu0 %v1850_v50, %s1684_s29 }
 0x18a   :  { %1049 = vrot.lane.b32.xlu1 %v1850_v50, %s1683_s3  ;;  %513 = vrot.lane.b32.xlu0 %v1850_v50, %s1685_s30 }
 0x18e   :  { %945 = vrot.lane.b32.xlu1 %v1850_v50, %s1686_s8  ;;  %633 = vrot.lane.b32.xlu0 %v1852_v51, %s1684_s29 }
 0x192   :  { %857 = vrot.lane.b32.xlu1 %v1852_v51, %s1689_s11  ;;  %409 = vrot.lane.b32.xlu0 %v1850_v50, %s1687_s9 }
 0x196   :  { %625 = vrot.lane.b32.xlu1 %v1870_v54, %s1684_s29  ;;  %529 = vrot.lane.b32.xlu0 %v1852_v51, %s1685_s30 }
 0x19a   :  { %521 = vrot.lane.b32.xlu1 %v1870_v54, %s1685_s30  ;;  %304 = vrot.lane.b32.xlu0 %v1850_v50, %s1688_s10 }
 0x19e   :  { %537 = vrot.lane.b32.xlu1 %v1880_v57, %s1685_s30  ;;  %425 = vrot.lane.b32.xlu0 %v1852_v51, %s1687_s9 }
 0x1a2   :  { %417 = vrot.lane.b32.xlu1 %v1870_v54, %s1687_s9  ;;  %320 = vrot.lane.b32.xlu0 %v1852_v51, %s1688_s10 }
 0x1a6   :  { %433 = vrot.lane.b32.xlu1 %v1880_v57, %s1687_s9  ;;  %961 = vrot.lane.b32.xlu0 %v1852_v51, %s1686_s8 }
 0x1aa   :  { %312 = vrot.lane.b32.xlu1 %v1870_v54, %s1688_s10  ;;  %1057 = vrot.lane.b32.xlu0 %v1870_v54, %s1683_s3 }
 0x1ae   :  { %328 = vrot.lane.b32.xlu1 %v1880_v57, %s1688_s10  ;;  %641 = vrot.lane.b32.xlu0 %v1880_v57, %s1684_s29 }
 0x1b2   :  { %953 = vrot.lane.b32.xlu1 %v1870_v54, %s1686_s8  ;;  %849 = vrot.lane.b32.xlu0 %v1870_v54, %s1689_s11 }
 0x1b6   :  { %1067 = vrot.lane.b32.xlu1 %v1910_v63, %s1683_s3  ;;  %619 = vrot.lane.b32.xlu0 %v1908_v62, %s1684_s29 }
 0x1ba   :  { %1051 = vrot.lane.b32.xlu1 %v1908_v62, %s1683_s3  ;;  %515 = vrot.lane.b32.xlu0 %v1908_v62, %s1685_s30 }
 0x1be   :  { %947 = vrot.lane.b32.xlu1 %v1908_v62, %s1686_s8  ;;  %635 = vrot.lane.b32.xlu0 %v1910_v63, %s1684_s29 }
 0x1c2   :  { %859 = vrot.lane.b32.xlu1 %v1910_v63, %s1689_s11  ;;  %411 = vrot.lane.b32.xlu0 %v1908_v62, %s1687_s9 }
 0x1c6   :  { %843 = vrot.lane.b32.xlu1 %v1908_v62, %s1689_s11  ;;  %531 = vrot.lane.b32.xlu0 %v1910_v63, %s1685_s30 }
 0x1ca   :  { %627 = vrot.lane.b32.xlu1 %v1933_v2, %s1684_s29  ;;  %306 = vrot.lane.b32.xlu0 %v1908_v62, %s1688_s10 }
 0x1cc   :  { %v1940_v6 = vpop.permute.xlu1 %1063  ;;  %v1942_v7 = vpop.permute.xlu0 %615 }
 0x1ce   :  { %523 = vrot.lane.b32.xlu1 %v1933_v2, %s1685_s30  ;;  %427 = vrot.lane.b32.xlu0 %v1910_v63, %s1687_s9 }
 0x1d0   :  { %v1950_v9 = vpop.permute.xlu1 %1047  ;;  %v1952_v10 = vpop.permute.xlu0 %511 }
 0x1d2   :  { %539 = vrot.lane.b32.xlu1 %v1948_v8, %s1685_s30  ;;  %322 = vrot.lane.b32.xlu0 %v1910_v63, %s1688_s10 }
 0x1d4   :  { %v1958_v11 = vpop.permute.xlu1 %943  ;;  %v1960_v12 = vpop.permute.xlu0 %631 }
 0x1d5   :  { %3208 = vst [vmem:[#allocation21_spill] sm:$0xff] %v1958_v11  ;;  %3209 = vst [vmem:[#allocation22_spill] sm:$0xff] %v1960_v12 }
 0x1d6   :  { %419 = vrot.lane.b32.xlu1 %v1933_v2, %s1687_s9  ;;  %963 = vrot.lane.b32.xlu0 %v1910_v63, %s1686_s8 }
 0x1d8   :  { %v1966_v13 = vpop.permute.xlu1 %623  ;;  %v1968_v14 = vpop.permute.xlu0 %407 }
 0x1da   :  { %435 = vrot.lane.b32.xlu1 %v1948_v8, %s1687_s9  ;;  %1059 = vrot.lane.b32.xlu0 %v1933_v2, %s1683_s3 }
 0x1dc   :  { %v1974_v15 = vpop.permute.xlu1 %519  ;;  %v1976_v16 = vpop.permute.xlu0 %527 }
 0x1de   :  { %314 = vrot.lane.b32.xlu1 %v1933_v2, %s1688_s10  ;;  %643 = vrot.lane.b32.xlu0 %v1948_v8, %s1684_s29 }
 0x1e0   :  { %v1982_v17 = vpop.permute.xlu1 %535  ;;  %v1984_v18 = vpop.permute.xlu0 %302 }
 0x1e1   :  { %3210 = vst [vmem:[#allocation23_spill] sm:$0xff] %v1984_v18 }
 0x1e2   :  { %330 = vrot.lane.b32.xlu1 %v1948_v8, %s1688_s10  ;;  %851 = vrot.lane.b32.xlu0 %v1933_v2, %s1689_s11 }
 0x1e4   :  { %v1992_v23 = vpop.permute.xlu1 %415  ;;  %v1994_v24 = vpop.permute.xlu0 %423 }
 0x1e6   :  { %955 = vrot.lane.b32.xlu1 %v1933_v2, %s1686_s8  ;;  %971 = vrot.lane.b32.xlu0 %v1948_v8, %s1686_s8 }
 0x1e8   :  { %v2004_v27 = vpop.permute.xlu1 %431  ;;  %v2006_v28 = vpop.permute.xlu0 %318 }
 0x1ea   :  { %1069 = vrot.lane.b32.xlu1 %v2002_v26, %s1683_s3  ;;  %621 = vrot.lane.b32.xlu0 %v2000_v25, %s1684_s29 }
 0x1ec   :  { %v2012_v29 = vpop.permute.xlu1 %310  ;;  %v2014_v31 = vpop.permute.xlu0 %959 }
 0x1ed   :  { %3213 = vst [vmem:[#allocation26_spill] sm:$0xff] %v2014_v31 }
 0x1ee   :  { %1053 = vrot.lane.b32.xlu1 %v2000_v25, %s1683_s3  ;;  %517 = vrot.lane.b32.xlu0 %v2000_v25, %s1685_s30 }
 0x1f0   :  { %v2020_v32 = vpop.permute.xlu1 %326  ;;  %v2022_v33 = vpop.permute.xlu0 %1055 }
 0x1f1   :  { %3214 = vst [vmem:[#allocation27_spill] sm:$0xff] %v2020_v32 }
 0x1f2   :  { %949 = vrot.lane.b32.xlu1 %v2000_v25, %s1686_s8  ;;  %637 = vrot.lane.b32.xlu0 %v2002_v26, %s1684_s29 }
 0x1f4   :  { %v2028_v34 = vpop.permute.xlu1 %951  ;;  %v2030_v35 = vpop.permute.xlu0 %639 }
 0x1f5   :  { %3215 = vst [vmem:[#allocation28_spill] sm:$0xff] %v2028_v34 }
 0x1f6   :  { %861 = vrot.lane.b32.xlu1 %v2002_v26, %s1689_s11  ;;  %413 = vrot.lane.b32.xlu0 %v2000_v25, %s1687_s9 }
 0x1f8   :  { %v2037_v40 = vpop.permute.xlu1 %1065  ;;  %v2039_v42 = vpop.permute.xlu0 %617 }
 0x1fa   :  { %845 = vrot.lane.b32.xlu1 %v2000_v25, %s1689_s11  ;;  %533 = vrot.lane.b32.xlu0 %v2002_v26, %s1685_s30 }
 0x1fc   :  { %v2047_v45 = vpop.permute.xlu1 %1049  ;;  %v2049_v46 = vpop.permute.xlu0 %513 }
 0x1fd   :  { %3217 = vst [vmem:[#allocation30_spill] sm:$0xff] %v2049_v46 }
 0x1fe   :  { %629 = vrot.lane.b32.xlu1 %v2045_v43, %s1684_s29  ;;  %308 = vrot.lane.b32.xlu0 %v2000_v25, %s1688_s10 }
 0x200   :  { %v2055_v47 = vpop.permute.xlu1 %945  ;;  %v2057_v48 = vpop.permute.xlu0 %633 }
 0x201   :  { %3218 = vst [vmem:[#allocation31_spill] sm:$0xff] %v2055_v47  ;;  %3219 = vst [vmem:[#allocation32_spill] sm:$0xff] %v2057_v48 }
 0x202   :  { %841 = vrot.lane.b32.xlu1 %v1850_v50, %s1689_s11  ;;  %429 = vrot.lane.b32.xlu0 %v2002_v26, %s1687_s9 }
 0x204   :  { %v2063_v49 = vpop.permute.xlu1 %857  ;;  %v2065_v52 = vpop.permute.xlu0 %409 }
 0x205   :  { %3220 = vst [vmem:[#allocation33_spill] sm:$0xff] %v2063_v49  ;;  %3221 = vst [vmem:[#allocation34_spill] sm:$0xff] %v2065_v52  ;;  %v1614_v52 = vld [vmem:[%s3124_s6 + $0x2] ss:$8 sm:$0xf] }
 0x206   :  { %855 = vrot.lane.b32.xlu1 %v1800_v38, %s1689_s11  ;;  %324 = vrot.lane.b32.xlu0 %v2002_v26, %s1688_s10 }
 0x208   :  { %v2071_v55 = vpop.permute.xlu1 %625  ;;  %v530_v56 = vpop.permute.xlu0 %529 }
 0x20a   :  { %839 = vrot.lane.b32.xlu1 %v1798_v37, %s1689_s11  ;;  %965 = vrot.lane.b32.xlu0 %v2002_v26, %s1686_s8 }
 0x20c   :  { %v2082_v61 = vpop.permute.xlu1 %521  ;;  %v305_v0 = vpop.permute.xlu0 %304 }
 0x20d   :  { %3222 = vst [vmem:[#allocation35_spill] sm:$0xff] %v2082_v61  ;;  %v2087_v1 = vsel %vm543_vm1, %v2082_v61, %v530_v56 }
 0x20e   :  { %3223 = vst [vmem:[#allocation36_spill] sm:$0xff] %v2087_v1  ;;  %757 = vrot.lane.b32.xlu1 %v2002_v26, %s1690_s5  ;;  %1061 = vrot.lane.b32.xlu0 %v2045_v43, %s1683_s3 }
 0x210   :  { %v2095_v30 = vpop.permute.xlu1 %537  ;;  %v426_v5 = vpop.permute.xlu0 %425 }
 0x211   :  { %3225 = vst [vmem:[#allocation38_spill] sm:$0xff] %v2095_v30  ;;  %v2100_v19 = vsel %vm543_vm1, %v530_v56, %v2095_v30 }
 0x212   :  { %3226 = vst [vmem:[#allocation39_spill] sm:$0xff] %v2100_v19  ;;  %525 = vrot.lane.b32.xlu1 %v2045_v43, %s1685_s30  ;;  %645 = vrot.lane.b32.xlu0 %v2093_v3, %s1684_s29 }
 0x214   :  { %v2107_v20 = vpop.permute.xlu1 %417  ;;  %v321_v21 = vpop.permute.xlu0 %320 }
 0x215   :  { %3227 = vst [vmem:[#allocation40_spill] sm:$0xff] %v2107_v20  ;;  %v2112_v22 = vsel %vm439_vm2, %v2107_v20, %v426_v5 }
 0x216   :  { %3228 = vst [vmem:[#allocation41_spill] sm:$0xff] %v2112_v22  ;;  %541 = vrot.lane.b32.xlu1 %v2093_v3, %s1685_s30  ;;  %969 = vrot.lane.b32.xlu0 %v1880_v57, %s1686_s8  ;;  %v2241_v22 = vld [vmem:[#allocation3 + $0x8] sm:$0xff] }
 0x217   :  { %3247 = vst [vmem:[#allocation60_spill] sm:$0xff] %v2241_v22  ;;  %1366 = vmatprep.mubr.f32.mxu0 %v2241_v22 }
 0x218   :  { %v2118_v36 = vpop.permute.xlu1 %433  ;;  %v2120_v39 = vpop.permute.xlu0 %961 }
 0x219   :  { %3229 = vst [vmem:[#allocation42_spill] sm:$0xff] %v2118_v36  ;;  %3230 = vst [vmem:[#allocation43_spill] sm:$0xff] %v2120_v39  ;;  %v2125_v56 = vsel %vm439_vm2, %v426_v5, %v2118_v36 }
 0x21a   :  { %3231 = vst [vmem:[#allocation44_spill] sm:$0xff] %v2125_v56  ;;  %421 = vrot.lane.b32.xlu1 %v2045_v43, %s1687_s9  ;;  %847 = vrot.lane.b32.xlu0 %v1814_v41, %s1689_s11 }
 0x21c   :  { %v313_v58 = vpop.permute.xlu1 %312  ;;  %v2132_v60 = vpop.permute.xlu0 %1057 }
 0x21d   :  { %v2136_v4 = vsel %vm336_vm3, %v313_v58, %v321_v21  ;;  %v2140_v53 = vsel %vm336_vm3, %v305_v0, %v313_v58 }
 0x21e   :  { %3232 = vst [vmem:[#allocation45_spill] sm:$0xff] %v2136_v4  ;;  %3233 = vst [vmem:[#allocation46_spill] sm:$0xff] %v2140_v53  ;;  %437 = vrot.lane.b32.xlu1 %v2093_v3, %s1687_s9  ;;  %967 = vrot.lane.b32.xlu0 %v1824_v44, %s1686_s8 }
 0x220   :  { %v329_v5 = vpop.permute.xlu1 %328  ;;  %v2146_v26 = vpop.permute.xlu0 %641 }
 0x221   :  { %v2150_v49 = vsel %vm336_vm3, %v321_v21, %v329_v5  ;;  %v2154_v39 = vsel %vm336_vm3, %v329_v5, %v305_v0 }
 0x222   :  { %3234 = vst [vmem:[#allocation47_spill] sm:$0xff] %v2150_v49  ;;  %3235 = vst [vmem:[#allocation48_spill] sm:$0xff] %v2154_v39  ;;  %316 = vrot.lane.b32.xlu1 %v2045_v43, %s1688_s10  ;;  %747 = vrot.lane.b32.xlu0 %v1933_v2, %s1690_s5 }
 0x224   :  { %v2160_v58 = vpop.permute.xlu1 %953  ;;  %v2162_v47 = vpop.permute.xlu0 %849 }
 0x225   :  { %3236 = vst [vmem:[#allocation49_spill] sm:$0xff] %v2160_v58  ;;  %3237 = vst [vmem:[#allocation50_spill] sm:$0xff] %v2162_v47 }
 0x226   :  { %332 = vrot.lane.b32.xlu1 %v2093_v3, %s1688_s10  ;;  %867 = vrot.lane.b32.xlu0 %v1948_v8, %s1689_s11 }
 0x228   :  { %v2168_v21 = vpop.permute.xlu1 %1067  ;;  %v2170_v0 = vpop.permute.xlu0 %619 }
 0x229   :  { %3238 = vst [vmem:[#allocation51_spill] sm:$0xff] %v2168_v21 }
 0x22a   :  { %741 = vrot.lane.b32.xlu1 %v2000_v25, %s1690_s5  ;;  %745 = vrot.lane.b32.xlu0 %v1870_v54, %s1690_s5 }
 0x22c   :  { %v2176_v5 = vpop.permute.xlu1 %1051  ;;  %v516_v2 = vpop.permute.xlu0 %515 }
 0x22d   :  { %3239 = vst [vmem:[#allocation52_spill] sm:$0xff] %v2176_v5 }
 0x22e   :  { %957 = vrot.lane.b32.xlu1 %v2045_v43, %s1686_s8  ;;  %865 = vrot.lane.b32.xlu0 %v1880_v57, %s1689_s11 }
 0x230   :  { %v2182_v49 = vpop.permute.xlu1 %947  ;;  %v2184_v39 = vpop.permute.xlu0 %635 }
 0x232   :  { %755 = vrot.lane.b32.xlu1 %v1910_v63, %s1690_s5  ;;  %743 = vrot.lane.b32.xlu0 %v1814_v41, %s1690_s5 }
 0x234   :  { %v2190_v54 = vpop.permute.xlu1 %859  ;;  %v412_v25 = vpop.permute.xlu0 %411 }
 0x235   :  { %3240 = vst [vmem:[#allocation53_spill] sm:$0xff] %v2190_v54 }
 0x236   :  { %739 = vrot.lane.b32.xlu1 %v1908_v62, %s1690_s5  ;;  %853 = vrot.lane.b32.xlu0 %v2045_v43, %s1689_s11 }
 0x238   :  { %v2196_v47 = vpop.permute.xlu1 %843  ;;  %v532_v58 = vpop.permute.xlu0 %531 }
 0x239   :  { %3241 = vst [vmem:[#allocation54_spill] sm:$0xff] %v2196_v47 }
 0x23a   :  { %753 = vrot.lane.b32.xlu1 %v1852_v51, %s1690_s5  ;;  %973 = vrot.lane.b32.xlu0 %v2093_v3, %s1686_s8 }
 0x23c   :  { %v628_v63 = vpop.permute.xlu1 %627  ;;  %v307_v41 = vpop.permute.xlu0 %306 }
 0x23d   :  { %v2206_v62 = vsel %vm647_vm4, %v628_v63, %v2184_v39  ;;  %v2211_v47 = vsel %vm647_vm4, %v2170_v0, %v628_v63 }
 0x23e   :  { %3242 = vst [vmem:[#allocation55_spill] sm:$0xff] %v2206_v62  ;;  %737 = vrot.lane.b32.xlu1 %v1850_v50, %s1690_s5  ;;  %749 = vrot.lane.b32.xlu0 %v2045_v43, %s1690_s5  ;;  %v652_v62 = vsel %vm647_vm4, %v1966_v13, %v1960_v12 }
 0x240   :  { %v524_v51 = vpop.permute.xlu1 %523  ;;  %v428_v54 = vpop.permute.xlu0 %427 }
 0x241   :  { %v2219_v4 = vsel %vm543_vm1, %v524_v51, %v532_v58  ;;  %v2223_v53 = vsel %vm543_vm1, %v516_v2, %v524_v51 }
 0x242   :  { %3243 = vst [vmem:[#allocation56_spill] sm:$0xff] %v2219_v4  ;;  %3244 = vst [vmem:[#allocation57_spill] sm:$0xff] %v2223_v53  ;;  %751 = vrot.lane.b32.xlu1 %v1800_v38, %s1690_s5  ;;  %869 = vrot.lane.b32.xlu0 %v2093_v3, %s1689_s11 }
 0x244   :  { %v540_v63 = vpop.permute.xlu1 %539  ;;  %v323_v50 = vpop.permute.xlu0 %322 }
 0x245   :  { %v2231_v43 = vsel %vm543_vm1, %v532_v58, %v540_v63  ;;  %v2235_v56 = vsel %vm543_vm1, %v540_v63, %v516_v2 }
 0x246   :  { %3245 = vst [vmem:[#allocation58_spill] sm:$0xff] %v2231_v43  ;;  %3246 = vst [vmem:[#allocation59_spill] sm:$0xff] %v2235_v56  ;;  %735 = vrot.lane.b32.xlu1 %v1798_v37, %s1690_s5  ;;  %863 = vrot.lane.b32.xlu0 %v1824_v44, %s1689_s11  ;;  %v1613_v43 = vld [vmem:[%s3124_s6 + $0x1] ss:$8 sm:$0xf] }
 0x248   :  { %v420_v51 = vpop.permute.xlu1 %419  ;;  %v964_v38 = vpop.permute.xlu0 %963 }
 0x249   :  { %v2245_v1 = vsel %vm439_vm2, %v420_v51, %v428_v54  ;;  %v2249_v58 = vsel %vm439_vm2, %v412_v25, %v420_v51 }
 0x24a   :  { %3248 = vst [vmem:[#allocation61_spill] sm:$0xff] %v2245_v1  ;;  %3249 = vst [vmem:[#allocation62_spill] sm:$0xff] %v2249_v58  ;;  %763 = vrot.lane.b32.xlu1 %v1948_v8, %s1690_s5  ;;  %765 = vrot.lane.b32.xlu0 %v2093_v3, %s1690_s5 }
 0x24c   :  { %v436_v2 = vpop.permute.xlu1 %435  ;;  %v2256_v63 = vpop.permute.xlu0 %1059 }
 0x24d   :  { %v2260_v37 = vsel %vm439_vm2, %v428_v54, %v436_v2  ;;  %v2264_v1 = vsel %vm439_vm2, %v436_v2, %v412_v25 }
 0x24e   :  { %3250 = vst [vmem:[#allocation63_spill] sm:$0xff] %v2260_v37  ;;  %3251 = vst [vmem:[#allocation64_spill] sm:$0xff] %v2264_v1  ;;  %759 = vrot.lane.b32.xlu1 %v1824_v44, %s1690_s5  ;;  %761 = vrot.lane.b32.xlu0 %v1880_v57, %s1690_s5 }
 0x250   :  { %v315_v51 = vpop.permute.xlu1 %314  ;;  %v2270_v22 = vpop.permute.xlu0 %643 }
 0x251   :  { %v2274_v58 = vsel %vm336_vm3, %v315_v51, %v323_v50  ;;  %v2278_v54 = vsel %vm336_vm3, %v307_v41, %v315_v51 }
 0x252   :  { %3252 = vst [vmem:[#allocation65_spill] sm:$0xff] %v2274_v58  ;;  %3253 = vst [vmem:[#allocation66_spill] sm:$0xff] %v2278_v54  ;;  %1075 = vrot.lane.b32.xlu1 %v1948_v8, %s1683_s3  ;;  %1077 = vrot.lane.b32.xlu0 %v2093_v3, %s1683_s3  ;;  %v1615_v54 = vld [vmem:[%s3124_s6 + $0x3] ss:$8 sm:$0xf] }
 0x254   :  { %v331_v25 = vpop.permute.xlu1 %330  ;;  %v2284_v2 = vpop.permute.xlu0 %851 }
 0x255   :  { %3254 = vst [vmem:[#allocation67_spill] sm:$0xff] %v2284_v2  ;;  %v2288_v37 = vsel %vm336_vm3, %v323_v50, %v331_v25  ;;  %v2292_v58 = vsel %vm336_vm3, %v331_v25, %v307_v41 }
 0x256   :  { %3255 = vst [vmem:[#allocation68_spill] sm:$0xff] %v2288_v37  ;;  %3256 = vst [vmem:[#allocation69_spill] sm:$0xff] %v2292_v58  ;;  %1071 = vrot.lane.b32.xlu1 %v1824_v44, %s1683_s3  ;;  %1073 = vrot.lane.b32.xlu0 %v1880_v57, %s1683_s3 }
 0x258   :  { %v956_v51 = vpop.permute.xlu1 %955  ;;  %v972_v8 = vpop.permute.xlu0 %971 }
 0x259   :  { %v2301_v3 = vsel %vm975_vm5, %v956_v51, %v964_v38  ;;  %v2306_v50 = vsel %vm975_vm5, %v2182_v49, %v956_v51  ;;  %v2310_v41 = vsel %vm975_vm5, %v964_v38, %v972_v8  ;;  %v2315_v25 = vsel %vm975_vm5, %v972_v8, %v2182_v49 }
 0x25a   :  { %3257 = vst [vmem:[#allocation70_spill] sm:$0xff] %v2301_v3  ;;  %3258 = vst [vmem:[#allocation71_spill] sm:$0xff] %v2306_v50  ;;  %v3264_v50 = vlaneseq }
 0x25b   :  { %3259 = vst [vmem:[#allocation72_spill] sm:$0xff] %v2310_v41  ;;  %3260 = vst [vmem:[#allocation73_spill] sm:$0xff] %v2315_v25 }
 0x25c   :  { %v2317_v44 = vpop.permute.xlu1 %1069  ;;  %v2319_v57 = vpop.permute.xlu0 %621  ;;  %v356_v38 = vshrl.u32 %v3264_v50, 7 }
 0x25d   :  { %3261 = vst [vmem:[#allocation74_spill] sm:$0xff] %v2317_v44 }
 0x25e   :  { %v2334_v8 = vsub.s32 1, %v356_v38  ;;  %v2359_v4 = vsub.s32 2, %v356_v38  ;;  %v2364_v20 = vsub.s32 0, %v356_v38 }
 0x260   :  { %v2321_v2 = vpop.permute.xlu1 %1053  ;;  %v2323_v3 = vpop.permute.xlu0 %517  ;;  %3267 = vst [vmem:[#allocation79_spill] sm:$0xff] %v2334_v8  ;;  %3273 = vst [vmem:[#allocation85_spill] sm:$0xff] %v2364_v20  ;;  %v2382_v11 = vrot.slane %v1614_v52, %v2359_v4  ;;  %v2390_v34 = vrot.slane %v1614_v52, %v2334_v8  ;;  %v2393_v31 = vrot.slane %v1614_v52, %v2364_v20 }
 0x261   :  { %3262 = vst [vmem:[#allocation75_spill] sm:$0xff] %v2321_v2  ;;  %v2408_v56 = vrot.slane %v1613_v43, %v2364_v20 }
 0x264   :  { %v2325_v37 = vpop.permute.xlu1 %949  ;;  %v2327_v51 = vpop.permute.xlu0 %637 }
 0x265   :  { %3263 = vst [vmem:[#allocation76_spill] sm:$0xff] %v2325_v37  ;;  %v2344_v37 = vrot.slane %v1615_v54, %v2334_v8 }
 0x268   :  { %v2330_v41 = vpop.permute.xlu1 %861  ;;  %v2332_v58 = vpop.permute.xlu0 %413 }
 0x269   :  { %3265 = vst [vmem:[#allocation77_spill] sm:$0xff] %v2330_v41  ;;  %3266 = vst [vmem:[#allocation78_spill] sm:$0xff] %v2332_v58 }
 0x26c   :  { %v2336_v49 = vpop.permute.xlu1 %845  ;;  %v2338_v25 = vpop.permute.xlu0 %533 }
 0x26d   :  { %3268 = vst [vmem:[#allocation80_spill] sm:$0xff] %v2336_v49  ;;  %3269 = vst [vmem:[#allocation81_spill] sm:$0xff] %v2338_v25  ;;  %v2405_v25 = vrot.slane %v1613_v43, %v2334_v8 }
 0x270   :  { %v2346_v1 = vpop.permute.xlu1 %629  ;;  %v2348_v50 = vpop.permute.xlu0 %308 }
 0x271   :  { %3270 = vst [vmem:[#allocation82_spill] sm:$0xff] %v2348_v50  ;;  %v659_v41 = vsel %vm647_vm4, %v2319_v57, %v2346_v1  ;;  %v2366_v50 = vsub.s32 3, %v356_v38  ;;  %v2387_v38 = vld [vmem:[%s3124_s6 + $0x20] ss:$8 sm:$0xf] }
 0x272   :  { %v700_v49 = vmul.f32 %v2344_v37, %v659_v41  ;;  %v353_v41 = vld [vmem:[%s3124_s6] ss:$8 sm:$0xf]  ;;  %3276 = vst [vmem:[#allocation88_spill] sm:$0xff] %v2387_v38  ;;  %v1106_v12 = vrot.slane %v2387_v38, %v2334_v8 }
 0x273   :  { %v2402_v58 = vrot.slane %v1614_v52, %v2366_v50  ;;  %v2411_v32 = vrot.slane %v353_v41, %v2359_v4  ;;  %v2414_v53 = vrot.slane %v1613_v43, %v2366_v50  ;;  %v2417_v30 = vrot.slane %v353_v41, %v2334_v8  ;;  %v2422_v52 = vld [vmem:[%s3124_s6 + $0x6] ss:$8 sm:$0xf] }
 0x274   :  { %v2355_v36 = vpop.permute.xlu1 %841  ;;  %1302 = vmatprep.subr.mxu0 %v700_v49  ;;  %v2357_v19 = vpop.permute.xlu0 %429  ;;  %v2429_v46 = vrot.slane %v353_v41, %v2364_v20 }
 0x275   :  { %3271 = vst [vmem:[#allocation83_spill] sm:$0xff] %v2355_v36  ;;  %3272 = vst [vmem:[#allocation84_spill] sm:$0xff] %v2357_v19  ;;  %v2379_v19 = vrot.slane %v1615_v54, %v2359_v4 }
 0x276   :  { %3277 = vst [vmem:[#allocation89_spill] sm:$0xff] %v2411_v32  ;;  %3278 = vst [vmem:[#allocation90_spill] sm:$0xff] %v2414_v53  ;;  %v2444_v32 = vrot.slane %v1615_v54, %v2364_v20  ;;  %v2452_v53 = vrot.slane %v1615_v54, %v2366_v50 }
 0x277   :  { %3279 = vst [vmem:[#allocation91_spill] sm:$0xff] %v2417_v30  ;;  %3280 = vst [vmem:[#allocation92_spill] sm:$0xff] %v2429_v46  ;;  %v2449_v46 = vrot.slane %v353_v41, %v2366_v50  ;;  %v656_v41 = vsel %vm647_vm4, %v1942_v7, %v1966_v13  ;;  %v556_v13 = vsel %vm543_vm1, %v1982_v17, %v1952_v10 }
 0x278   :  { %v2374_v49 = vpop.permute.xlu1 %855  ;;  %v2376_v36 = vpop.permute.xlu0 %324 }
 0x279   :  { %3274 = vst [vmem:[#allocation86_spill] sm:$0xff] %v2374_v49  ;;  %3275 = vst [vmem:[#allocation87_spill] sm:$0xff] %v2376_v36  ;;  %v2396_v49 = vrot.slane %v1613_v43, %v2359_v4  ;;  %v1618_v36 = vld [vmem:[%s3124_s6 + $0x7] ss:$8 sm:$0xf]  ;;  %v2434_v43 = vrot.slane %v2387_v38, %v2364_v20  ;;  %v2470_v38 = vmul.f32 %v2379_v19, %v652_v62 }
 0x27a   :  { %v2441_v48 = vrot.slane %v1618_v36, %v2364_v20  ;;  %v2455_v18 = vrot.slane %v1618_v36, %v2334_v8  ;;  %v2473_v54 = vrot.slane %v1618_v36, %v2359_v4  ;;  %v544_v62 = vsel %vm543_vm1, %v1976_v16, %v1982_v17 }
 0x27b   :  { %v448_v17 = vsel %vm439_vm2, %v1968_v14, %v1992_v23 }
 0x27c   :  { %v2436_v30 = vpop.permute.xlu1 %839  ;;  %v2438_v61 = vpop.permute.xlu0 %965  ;;  %3283 = vst [vmem:[#allocation95_spill] sm:$0xff] %v2455_v18  ;;  %3286 = vst [vmem:[#allocation98_spill] sm:$0xff] %v2473_v54  ;;  %v2476_v18 = vrot.slane %v1618_v36, %v2366_v50  ;;  %v444_v54 = vsel %vm439_vm2, %v1992_v23, %v1994_v24 }
 0x27d   :  { %3281 = vst [vmem:[#allocation93_spill] sm:$0xff] %v2436_v30  ;;  %3282 = vst [vmem:[#allocation94_spill] sm:$0xff] %v2438_v61  ;;  %v2459_v30 = vrot.slane %v2422_v52, %v2334_v8  ;;  %v2463_v61 = vrot.slane %v2422_v52, %v2364_v20  ;;  %v552_v20 = vsel %vm543_vm1, %v1952_v10, %v1974_v15 }
 0x27e   :  { %3287 = vst [vmem:[#allocation99_spill] sm:$0xff] %v2476_v18  ;;  %v2530_v23 = vmul.f32 %v2390_v34, %v552_v20  ;;  %v1089_v20 = vsel %vm1079_vm6, %v2047_v45, %v2132_v60 }
 0x27f   :  { %3284 = vst [vmem:[#allocation96_spill] sm:$0xff] %v2459_v30  ;;  %3285 = vst [vmem:[#allocation97_spill] sm:$0xff] %v2463_v61  ;;  %v548_v61 = vsel %vm543_vm1, %v1974_v15, %v1976_v16  ;;  %v1086_v15 = vsel %vm1079_vm6, %v2256_v63, %v2168_v21 }
 0x280   :  { %v2494_v36 = vpop.permute.xlu1 %757  ;;  %v1062_v18 = vpop.permute.xlu0 %1061  ;;  %v2520_v30 = vmul.f32 %v2382_v11, %v548_v61 }
 0x281   :  { %3288 = vst [vmem:[#allocation100_spill] sm:$0xff] %v2494_v36  ;;  %v1087_v16 = vsel %vm1079_vm6, %v1062_v18, %v2317_v44  ;;  %v1091_v10 = vsel %vm1079_vm6, %v2321_v2, %v1062_v18  ;;  %v1090_v36 = vsel %vm1079_vm6, %v2176_v5, %v2256_v63  ;;  %v1085_v18 = vsel %vm1079_vm6, %v2132_v60, %v2037_v40 }
 0x282   :  { %v1131_v21 = vmul.f32 %v2434_v43, %v1091_v10  ;;  %v1132_v8 = vmul.f32 %v1106_v12, %v1087_v16  ;;  %v2527_v2 = vmul.f32 %v2344_v37, %v656_v41  ;;  %v2533_v44 = vmul.f32 %v2393_v31, %v556_v13 }
 0x283   :  { %v2536_v63 = vmul.f32 %v2396_v49, %v444_v54  ;;  %v1128_v16 = vmul.f32 %v1106_v12, %v1086_v15  ;;  %v2541_v5 = vmul.f32 %v2402_v58, %v544_v62  ;;  %v1127_v41 = vmul.f32 %v2434_v43, %v1090_v36 }
 0x284   :  { %v2538_v61 = vpop.permute.xlu1 %525  ;;  %1397 = vmatprep.subr.mxu1 %v1132_v8  ;;  %v646_v10 = vpop.permute.xlu0 %645  ;;  %v2552_v13 = vmul.f32 %v2405_v25, %v448_v17  ;;  %v1084_v8 = vsel %vm1079_vm6, %v2022_v33, %v1940_v6  ;;  %v1124_v62 = vmul.f32 %v1106_v12, %v1085_v18  ;;  %v662_v60 = vsel %vm647_vm4, %v2270_v22, %v2170_v0 }
 0x285   :  { %v663_v54 = vsel %vm647_vm4, %v646_v10, %v2319_v57  ;;  %1398 = vmatpush1.msra.mxu1 %v1131_v21  ;;  %v1088_v57 = vsel %vm1079_vm6, %v1950_v9, %v2022_v33  ;;  %v657_v21 = vsel %vm647_vm4, %v2039_v42, %v2071_v55  ;;  %v661_v15 = vsel %vm647_vm4, %v2146_v26, %v2039_v42 }
 0x286   :  { %v699_v36 = vmul.f32 %v2444_v32, %v663_v54  ;;  %1399 = vmatprep.subr.mxu1 %v1128_v16  ;;  %v696_v0 = vmul.f32 %v2344_v37, %v2211_v47  ;;  %v440_v17 = vsel %vm439_vm2, %v1994_v24, %v2004_v27  ;;  %v1123_v33 = vmul.f32 %v2434_v43, %v1089_v20 }
 0x287   :  { %1400 = vmatpush1.msra.mxu1 %v1127_v41  ;;  %v651_v18 = vsel %vm647_vm4, %v2327_v51, %v646_v10  ;;  %v452_v42 = vsel %vm439_vm2, %v2004_v27, %v1968_v14  ;;  %v341_v24 = vsel %vm336_vm3, %v2012_v29, %v2006_v28  ;;  %v695_v47 = vmul.f32 %v2444_v32, %v662_v60  ;;  %v2626_v60 = vld [vmem:[#allocation3 + $0x10] sm:$0xff] }
 0x288   :  { %v542_v16 = vpop.permute.xlu1 %541  ;;  %1303 = vmatpush1.msra.mxu0 %v699_v36  ;;  %1401 = vmatprep.subr.mxu1 %v1124_v62  ;;  %v2585_v54 = vpop.permute.xlu0 %969  ;;  %v1120_v20 = vmul.f32 %v1106_v12, %v1084_v8  ;;  %v1119_v10 = vmul.f32 %v2434_v43, %v1088_v57  ;;  %v660_v41 = vsel %vm647_vm4, %v2030_v35, %v1942_v7  ;;  %v3289_v36 = vld [vmem:[#allocation23_spill] sm:$0xff] }
 0x289   :  { %1304 = vmatprep.subr.mxu0 %v696_v0  ;;  %v692_v62 = vmul.f32 %v2344_v37, %v657_v21  ;;  %v691_v14 = vmul.f32 %v2444_v32, %v661_v15  ;;  %1402 = vmatpush1.msra.mxu1 %v1123_v33  ;;  %v655_v27 = vsel %vm647_vm4, %v2346_v1, %v2327_v51  ;;  %v3291_v21 = vld [vmem:[#allocation89_spill] sm:$0xff]  ;;  %v3292_v0 = vld [vmem:[#allocation32_spill] sm:$0xff] }
 0x28a   :  { %v555_v12 = vsel %vm543_vm1, %v2323_v3, %v2538_v61  ;;  %v702_v43 = vmul.f32 %v2452_v53, %v651_v18  ;;  %1305 = vmatpush1.msra.mxu0 %v695_v47  ;;  %1403 = vmatprep.subr.mxu1 %v1120_v20  ;;  %v2613_v7 = vmul.f32 %v2408_v56, %v452_v42  ;;  %v3294_v47 = vld [vmem:[#allocation35_spill] sm:$0xff] }
 0x28b   :  { %v650_v37 = vsel %vm647_vm4, %v2184_v39, %v2270_v22  ;;  %v559_v1 = vsel %vm543_vm1, %v542_v16, %v2323_v3  ;;  %1306 = vmatprep.subr.mxu0 %v692_v62  ;;  %1404 = vmatpush1.msra.mxu1 %v1119_v10  ;;  %v345_v57 = vsel %vm336_vm3, %v3289_v36, %v2012_v29  ;;  %v3290_v39 = vld [vmem:[#allocation90_spill] sm:$0xff]  ;;  %v3296_v10 = vld [vmem:[#allocation55_spill] sm:$0xff] }
 0x28c   :  { %v2622_v51 = vpop.permute.xlu1 %421  ;;  %v2624_v8 = vpop.permute.xlu0 %847  ;;  %v687_v22 = vmul.f32 %v2444_v32, %v660_v41  ;;  %1307 = vmatpush1.msra.mxu0 %v691_v14  ;;  %1444 = vmatprep.subr.mxu1 %v702_v43  ;;  %v2634_v3 = vmul.f32 %v3290_v39, %v440_v17  ;;  %v2637_v15 = vmul.f32 %v3291_v21, %v341_v24  ;;  %v3297_v62 = vld [vmem:[#allocation38_spill] sm:$0xff] }
 0x28d   :  { %v649_v33 = vsel %vm647_vm4, %v3292_v0, %v2146_v26  ;;  %v701_v18 = vmul.f32 %v2379_v19, %v655_v27  ;;  %v596_v42 = vmul.f32 %v2390_v34, %v555_v12  ;;  %1308 = vmatprep.subr.mxu0 %v2527_v2  ;;  %v653_v29 = vsel %vm647_vm4, %v2071_v55, %v3292_v0  ;;  %v3293_v26 = vld [vmem:[#allocation22_spill] sm:$0xff]  ;;  %v3298_v12 = vld [vmem:[#allocation57_spill] sm:$0xff]  ;;  %v3300_v0 = vld [vmem:[#allocation59_spill] sm:$0xff] }
 0x28e   :  { %v698_v32 = vmul.f32 %v2452_v53, %v650_v37  ;;  %v595_v17 = vmul.f32 %v2393_v31, %v559_v1  ;;  %1620 = vmatmul.mubr.msk.f32.vlgmr.msra.gmra.mxu1 %vm1298_vm7, %v2626_v60  ;;  %1309 = vmatpush1.msra.mxu0 %v687_v22  ;;  %v648_v24 = vsel %vm647_vm4, %v3293_v26, %v2030_v35  ;;  %v3295_v2 = vld [vmem:[#allocation30_spill] sm:$0xff]  ;;  %v3299_v37 = vld [vmem:[#allocation27_spill] sm:$0xff] }
 0x28f   :  { %v553_v20 = vsel %vm543_vm1, %v3295_v2, %v3294_v47  ;;  %v697_v55 = vmul.f32 %v2379_v19, %v3296_v10  ;;  %1445 = vmatpush1.msra.mxu1 %v701_v18  ;;  %1310 = vmatprep.subr.mxu0 %v596_v42  ;;  %v557_v14 = vsel %vm543_vm1, %v3297_v62, %v3295_v2  ;;  %v3301_v42 = vld [vmem:[#allocation81_spill] sm:$0xff]  ;;  %v3304_v2 = vld [vmem:[#allocation92_spill] sm:$0xff] }
 0x290   :  { %v438_v41 = vpop.permute.xlu1 %437  ;;  %v694_v27 = vmul.f32 %v2452_v53, %v649_v33  ;;  %v592_v35 = vmul.f32 %v2390_v34, %v3298_v12  ;;  %1446 = vmatprep.subr.mxu1 %v698_v32  ;;  %1311 = vmatpush1.msra.mxu0 %v595_v17  ;;  %v2671_v43 = vpop.permute.xlu0 %967  ;;  %v349_v1 = vsel %vm336_vm3, %v3299_v37, %v3289_v36  ;;  %v3306_v10 = vld [vmem:[#allocation28_spill] sm:$0xff]  ;;  %v3307_v62 = vld [vmem:[#allocation21_spill] sm:$0xff] }
 0x291   :  { %v693_v22 = vmul.f32 %v2379_v19, %v653_v29  ;;  %v591_v18 = vmul.f32 %v2393_v31, %v3300_v0  ;;  %v547_v33 = vsel %vm543_vm1, %v3301_v42, %v542_v16  ;;  %1447 = vmatpush1.msra.mxu1 %v697_v55  ;;  %v588_v32 = vmul.f32 %v2390_v34, %v553_v20  ;;  %v3302_v29 = vld [vmem:[#allocation78_spill] sm:$0xff]  ;;  %v3303_v34 = vld [vmem:[#allocation91_spill] sm:$0xff] }
 0x292   :  { %v551_v17 = vsel %vm543_vm1, %v2538_v61, %v3301_v42  ;;  %1448 = vmatprep.subr.mxu1 %v694_v27  ;;  %1312 = vmatprep.subr.mxu0 %v592_v35  ;;  %v690_v36 = vmul.f32 %v2452_v53, %v648_v24  ;;  %v587_v19 = vmul.f32 %v2393_v31, %v557_v14  ;;  %v3308_v27 = vld [vmem:[#allocation58_spill] sm:$0xff] }
 0x293   :  { %v451_v26 = vsel %vm439_vm2, %v3302_v29, %v2622_v51  ;;  %1449 = vmatpush1.msra.mxu1 %v693_v22  ;;  %1313 = vmatpush1.msra.mxu0 %v591_v18  ;;  %v2697_v47 = vmul.f32 %v3303_v34, %v345_v57  ;;  %v337_v61 = vsel %vm336_vm3, %v2006_v28, %v3299_v37  ;;  %v3305_v57 = vld [vmem:[#allocation26_spill] sm:$0xff]  ;;  %v3309_v37 = vld [vmem:[#allocation40_spill] sm:$0xff] }
 0x294   :  { %v2694_v16 = vpop.permute.xlu1 %316  ;;  %v598_v53 = vmul.f32 %v2402_v58, %v547_v33  ;;  %v455_v31 = vsel %vm439_vm2, %v438_v41, %v3302_v29  ;;  %1450 = vmatprep.subr.mxu1 %v690_v36  ;;  %1314 = vmatprep.subr.mxu0 %v588_v32  ;;  %v2707_v24 = vpop.permute.xlu0 %747  ;;  %v2710_v20 = vmul.f32 %v3304_v2, %v349_v1  ;;  %v3310_v1 = vld [vmem:[#allocation34_spill] sm:$0xff]  ;;  %v3312_v33 = vld [vmem:[#allocation39_spill] sm:$0xff] }
 0x295   :  { %v980_v55 = vsel %vm975_vm5, %v3306_v10, %v3305_v57  ;;  %v597_v28 = vmul.f32 %v2382_v11, %v551_v17  ;;  %1451 = vmatpush1.msra.mxu1 %v2470_v38  ;;  %1315 = vmatpush1.msra.mxu0 %v587_v19  ;;  %v984_v14 = vsel %vm975_vm5, %v3307_v62, %v3306_v10  ;;  %v3311_v38 = vld [vmem:[#allocation56_spill] sm:$0xff]  ;;  %v3313_v17 = vld [vmem:[#allocation42_spill] sm:$0xff] }
 0x296   :  { %v594_v12 = vmul.f32 %v2402_v58, %v3308_v27  ;;  %v492_v35 = vmul.f32 %v2405_v25, %v451_v26  ;;  %1452 = vmatprep.subr.mxu1 %v598_v53  ;;  %1316 = vmatprep.subr.mxu0 %v2530_v23  ;;  %v449_v22 = vsel %vm439_vm2, %v3310_v1, %v3309_v37  ;;  %v3314_v36 = vld [vmem:[#allocation62_spill] sm:$0xff]  ;;  %v3315_v26 = vld [vmem:[#allocation36_spill] sm:$0xff] }
 0x297   :  { %v593_v0 = vmul.f32 %v2382_v11, %v3311_v38  ;;  %v491_v18 = vmul.f32 %v2408_v56, %v455_v31  ;;  %1453 = vmatpush1.msra.mxu1 %v597_v28  ;;  %1317 = vmatpush1.msra.mxu0 %v2533_v44  ;;  %v590_v32 = vmul.f32 %v2402_v58, %v3312_v33  ;;  %v3316_v44 = vld [vmem:[#allocation64_spill] sm:$0xff] }
 0x298   :  { %v333_v42 = vpop.permute.xlu1 %332  ;;  %v453_v23 = vsel %vm439_vm2, %v3313_v17, %v3310_v1  ;;  %v488_v19 = vmul.f32 %v2405_v25, %v3314_v36  ;;  %1454 = vmatprep.subr.mxu1 %v594_v12  ;;  %1318 = vmatprep.subr.mxu0 %v492_v35  ;;  %v2742_v29 = vpop.permute.xlu0 %867  ;;  %v589_v53 = vmul.f32 %v2382_v11, %v3315_v26  ;;  %v3317_v10 = vld [vmem:[#allocation84_spill] sm:$0xff]  ;;  %v3324_v26 = vld [vmem:[#allocation46_spill] sm:$0xff] }
 0x299   :  { %v487_v31 = vmul.f32 %v2408_v56, %v3316_v44  ;;  %v443_v58 = vsel %vm439_vm2, %v3317_v10, %v438_v41  ;;  %1455 = vmatpush1.msra.mxu1 %v593_v0  ;;  %1319 = vmatpush1.msra.mxu0 %v491_v18  ;;  %v484_v28 = vmul.f32 %v2405_v25, %v449_v22  ;;  %v3318_v41 = vld [vmem:[#allocation82_spill] sm:$0xff]  ;;  %v3320_v22 = vld [vmem:[#allocation41_spill] sm:$0xff]  ;;  %v3321_v0 = vld [vmem:[#allocation44_spill] sm:$0xff] }
 0x29a   :  { %v447_v27 = vsel %vm439_vm2, %v2622_v51, %v3317_v10  ;;  %1456 = vmatprep.subr.mxu1 %v590_v32  ;;  %1320 = vmatprep.subr.mxu0 %v488_v19  ;;  %v2757_v11 = vmul.f32 %v2449_v46, %v337_v61  ;;  %v2760_v12 = vmul.f32 %v2441_v48, %v984_v14  ;;  %v3322_v32 = vld [vmem:[#allocation63_spill] sm:$0xff]  ;;  %v3325_v44 = vld [vmem:[#allocation45_spill] sm:$0xff] }
 0x29b   :  { %v483_v35 = vmul.f32 %v2408_v56, %v453_v23  ;;  %v348_v25 = vsel %vm336_vm3, %v3318_v41, %v2694_v16  ;;  %1457 = vmatpush1.msra.mxu1 %v589_v53  ;;  %1321 = vmatpush1.msra.mxu0 %v487_v31  ;;  %v494_v51 = vmul.f32 %v3290_v39, %v443_v58  ;;  %v3319_v56 = vld [vmem:[#allocation95_spill] sm:$0xff]  ;;  %v3323_v23 = vld [vmem:[#allocation61_spill] sm:$0xff]  ;;  %v3326_v31 = vld [vmem:[#allocation66_spill] sm:$0xff] }
 0x29c   :  { %v2767_v37 = vpop.permute.xlu1 %741  ;;  %v352_v61 = vsel %vm336_vm3, %v333_v42, %v3318_v41  ;;  %1458 = vmatprep.subr.mxu1 %v2541_v5  ;;  %1322 = vmatprep.subr.mxu0 %v484_v28  ;;  %v2774_v14 = vpop.permute.xlu0 %745  ;;  %v2777_v1 = vmul.f32 %v3319_v56, %v980_v55  ;;  %v485_v38 = vmul.f32 %v2396_v49, %v3320_v22  ;;  %v3328_v58 = vld [vmem:[#allocation31_spill] sm:$0xff]  ;;  %v3329_v28 = vld [vmem:[#allocation69_spill] sm:$0xff] }
 0x29d   :  { %v486_v18 = vmul.f32 %v3290_v39, %v3321_v0  ;;  %v493_v33 = vmul.f32 %v2396_v49, %v447_v27  ;;  %1459 = vmatpush1.msra.mxu1 %v2520_v30  ;;  %1323 = vmatpush1.msra.mxu0 %v483_v35  ;;  %v490_v5 = vmul.f32 %v3290_v39, %v3322_v32  ;;  %v3330_v35 = vld [vmem:[#allocation87_spill] sm:$0xff] }
 0x29e   :  { %v388_v17 = vmul.f32 %v3303_v34, %v348_v25  ;;  %v2790_v55 = vrot.slane %v2422_v52, %v2359_v4  ;;  %1460 = vmatprep.subr.mxu1 %v494_v51  ;;  %1324 = vmatprep.subr.mxu0 %v2552_v13  ;;  %v489_v36 = vmul.f32 %v2396_v49, %v3323_v23  ;;  %v3331_v25 = vld [vmem:[#allocation43_spill] sm:$0xff]  ;;  %v3332_v51 = vld [vmem:[#allocation33_spill] sm:$0xff] }
 0x29f   :  { %v387_v30 = vmul.f32 %v3304_v2, %v352_v61  ;;  %v2799_v19 = vrot.slane %v2422_v52, %v2366_v50  ;;  %1461 = vmatpush1.msra.mxu1 %v493_v33  ;;  %1325 = vmatpush1.msra.mxu0 %v2613_v7  ;;  %v380_v53 = vmul.f32 %v3303_v34, %v3324_v26  ;;  %v3327_v52 = vld [vmem:[#allocation49_spill] sm:$0xff]  ;;  %v3333_v61 = vld [vmem:[#allocation50_spill] sm:$0xff]  ;;  %v3335_v32 = vld [vmem:[#allocation47_spill] sm:$0xff] }
 0x2a0   :  { %v958_v39 = vpop.permute.xlu1 %957  ;;  %v2806_v13 = vmul.f32 %v3291_v21, %v3325_v44  ;;  %v384_v49 = vmul.f32 %v3303_v34, %v3326_v31  ;;  %1462 = vmatprep.subr.mxu1 %v490_v5  ;;  %1326 = vmatprep.subr.mxu0 %v388_v17  ;;  %v2810_v10 = vpop.permute.xlu0 %865  ;;  %v985_v7 = vsel %vm975_vm5, %v3328_v58, %v3327_v52  ;;  %v3336_v17 = vld [vmem:[#allocation94_spill] sm:$0xff]  ;;  %v3338_v31 = vld [vmem:[#allocation96_spill] sm:$0xff] }
 0x2a1   :  { %v383_v27 = vmul.f32 %v3304_v2, %v3329_v28  ;;  %v340_v41 = vsel %vm336_vm3, %v3330_v35, %v333_v42  ;;  %1463 = vmatpush1.msra.mxu1 %v489_v36  ;;  %1327 = vmatpush1.msra.mxu0 %v387_v30  ;;  %v981_v34 = vsel %vm975_vm5, %v3327_v52, %v3331_v25  ;;  %v3334_v42 = vld [vmem:[#allocation48_spill] sm:$0xff] }
 0x2a2   :  { %v877_v22 = vsel %vm871_vm8, %v3333_v61, %v3332_v51  ;;  %v344_v0 = vsel %vm336_vm3, %v2694_v16, %v3330_v35  ;;  %1464 = vmatprep.subr.mxu1 %v486_v18  ;;  %1328 = vmatprep.subr.mxu0 %v384_v49  ;;  %v379_v33 = vmul.f32 %v3304_v2, %v3334_v42  ;;  %v3337_v18 = vld [vmem:[#allocation76_spill] sm:$0xff]  ;;  %v3342_v35 = vld [vmem:[#allocation67_spill] sm:$0xff] }
 0x2a3   :  { %v382_v5 = vmul.f32 %v2449_v46, %v3335_v32  ;;  %v983_v23 = vsel %vm975_vm5, %v958_v39, %v3336_v17  ;;  %1465 = vmatpush1.msra.mxu1 %v485_v38  ;;  %1329 = vmatpush1.msra.mxu0 %v383_v27  ;;  %v1019_v30 = vmul.f32 %v2441_v48, %v985_v7  ;;  %v1616_v52 = vld [vmem:[%s3124_s6 + $0x5] ss:$8 sm:$0xf]  ;;  %s1691_s6 = smov [#allocation6]  }
 0x2a4   :  { %v2840_v36 = vpop.permute.xlu1 %755  ;;  %v390_v16 = vmul.f32 %v2449_v46, %v340_v41  ;;  %v987_v26 = vsel %vm975_vm5, %v3337_v18, %v958_v39  ;;  %1466 = vmatprep.subr.mxu1 %v2634_v3  ;;  %1330 = vmatprep.subr.mxu0 %v380_v53  ;;  %v2848_v2 = vpop.permute.xlu0 %743  ;;  %v1020_v44 = vmul.f32 %v3319_v56, %v981_v34  ;;  %v3339_v39 = vld [vmem:[#allocation65_spill] sm:$0xff]  ;;  %v3340_v53 = vld [vmem:[#allocation68_spill] sm:$0xff]  ;;  %v3343_v41 = vld [vmem:[#allocation54_spill] sm:$0xff]  ;;  %s1596_s24 = sshll.u32 %s1691_s6, 4  ;;  %s1597_s24 = int_to_ptr.vmem [resolvable:$true] %s1596_s24 }
 0x2a5   :  { %v2852_v38 = vmul.f32 %v3338_v31, %v877_v22  ;;  %v389_v49 = vmul.f32 %v3291_v21, %v344_v0  ;;  %1467 = vmatpush1.msra.mxu1 %v2536_v63  ;;  %1331 = vmatpush1.msra.mxu0 %v379_v33  ;;  %v385_v3 = vmul.f32 %v3291_v21, %v3339_v39  ;;  %v3341_v27 = vld [vmem:[#allocation53_spill] sm:$0xff]  ;;  %v3344_v22 = vld [vmem:[#allocation70_spill] sm:$0xff]  ;;  %v3345_v0 = vld [vmem:[#allocation79_spill] sm:$0xff]  ;;  %s1656_s25 = scalar_lea.vmem %s1597_s24, 512  ;;  %p1661_p6 = scmp.lt.s32.totalorder %s1597_s24, %s1597_s24 }
 0x2a6   :  { %v386_v7 = vmul.f32 %v2449_v46, %v3340_v53  ;;  %v1028_v28 = vmul.f32 %v3319_v56, %v983_v23  ;;  %1468 = vmatprep.subr.mxu1 %v390_v16  ;;  %1332 = vmatprep.subr.mxu0 %v2697_v47  ;;  %v878_v63 = vsel %vm871_vm8, %v3342_v35, %v3341_v27  ;;  %v3346_v33 = vld [vmem:[#allocation85_spill] sm:$0xff]  ;;  %v3347_v16 = vld [vmem:[#allocation71_spill] sm:$0xff]  ;;  %p1657_p5 = scmp.ne.s32.totalorder %s1597_s24, %s1656_s25  ;;  %p1662_p7 = scmp.lt.s32.totalorder %s1656_s25, %s1656_s25 }
 0x2a7   :  { %v882_v34 = vsel %vm871_vm8, %v3343_v41, %v3342_v35  ;;  %v1027_v21 = vmul.f32 %v2441_v48, %v987_v26  ;;  %1469 = vmatpush1.msra.mxu1 %v389_v49  ;;  %1333 = vmatpush1.msra.mxu0 %v2710_v20  ;;  %v1024_v47 = vmul.f32 %v3319_v56, %v3344_v22  ;;  %v3348_v56 = vld [vmem:[#allocation97_spill] sm:$0xff] }
 0x2a8   :  { %v2875_v46 = vpop.permute.xlu1 %739  ;;  %v2880_v42 = vrot.slane %v1616_v52, %v3345_v0  ;;  %1470 = vmatprep.subr.mxu1 %v386_v7  ;;  %1334 = vmatprep.subr.mxu0 %v1028_v28  ;;  %v2883_v32 = vrot.slane %v1616_v52, %v3346_v33  ;;  %v854_v23 = vpop.permute.xlu0 %853  ;;  %v1023_v26 = vmul.f32 %v2441_v48, %v3347_v16  ;;  %v3349_v7 = vld [vmem:[#allocation72_spill] sm:$0xff]  ;;  %v3350_v28 = vld [vmem:[#allocation98_spill] sm:$0xff]  ;;  %v3351_v22 = vld [vmem:[#allocation73_spill] sm:$0xff]  ;;  %p1663_p8 = por %p1662_p7, %p1661_p6 }
 0x2a9   :  { %1471 = vmatpush1.msra.mxu1 %v385_v3  ;;  %1335 = vmatpush2.msra.mxu0 %v1027_v21  ;;  %v2888_v20 = vrot.slane %v1616_v52, %v2359_v4  ;;  %v2891_v49 = vrot.slane %v1616_v52, %v2366_v50  ;;  %v919_v39 = vmul.f32 %v3348_v56, %v882_v34  ;;  %v3352_v0 = vld [vmem:[#allocation99_spill] sm:$0xff]  ;;  %v3354_v33 = vld [vmem:[#allocation77_spill] sm:$0xff]  ;;  %v3356_v16 = vld [vmem:[#allocation86_spill] sm:$0xff] }
 0x2aa   :  { %v920_v53 = vmul.f32 %v3338_v31, %v878_v63  ;;  %v1025_v35 = vmul.f32 %v3350_v28, %v3349_v7  ;;  %1472 = vmatprep.subr.mxu1 %v382_v5  ;;  %1336 = vmatprep.subr.mxu0 %v1024_v47  ;;  %v1026_v48 = vmul.f32 %v3352_v0, %v3351_v22  ;;  %v3353_v3 = vld [vmem:[#allocation83_spill] sm:$0xff]  ;;  %p1664_p9 = pnand %p1663_p8, %p1657_p5 }
 0x2ab   :  { %v881_v21 = vsel %vm871_vm8, %v3353_v3, %v3333_v61  ;;  %v879_v52 = vsel %vm871_vm8, %v854_v23, %v3354_v33  ;;  %1473 = vmatpush1.msra.mxu1 %v2806_v13  ;;  %1337 = vmatpush2.msra.mxu0 %v1023_v26  ;;  %v977_v5 = vsel %vm975_vm5, %v3331_v25, %v2585_v54  ;;  %v3355_v61 = vld [vmem:[#allocation80_spill] sm:$0xff] }
 0x2ac   :  { %v2907_v63 = vpop.permute.xlu1 %753  ;;  %v989_v34 = vsel %vm975_vm5, %v2585_v54, %v3328_v58  ;;  %v883_v47 = vsel %vm871_vm8, %v3355_v61, %v854_v23  ;;  %1474 = vmatprep.subr.mxu1 %v2757_v11  ;;  %1338 = vmatprep.subr.mxu0 %v1020_v44  ;;  %v974_v13 = vpop.permute.xlu0 %973  ;;  %v876_v26 = vsel %vm871_vm8, %v2624_v8, %v3356_v16  ;;  %v3357_v23 = vld [vmem:[#allocation60_spill] sm:$0xff] }
 0x2ad   :  { %1475 = vmatpush1.msra.mxu1 %v2637_v15  ;;  %1339 = vmatpush2.msra.mxu0 %v1019_v30  ;;  %v979_v54 = vsel %vm975_vm5, %v3336_v17, %v974_v13  ;;  %v991_v58 = vsel %vm975_vm5, %v974_v13, %v3337_v18  ;;  %v924_v11 = vmul.f32 %v3338_v31, %v879_v52  ;;  %v3358_v15 = vld [vmem:[#allocation93_spill] sm:$0xff] }
 0x2ae   :  { %v1029_v25 = vmul.f32 %v3350_v28, %v979_v54  ;;  %v1030_v44 = vmul.f32 %v3352_v0, %v991_v58  ;;  %1340 = vmatprep.subr.mxu0 %v2777_v1  ;;  %1508 = vmatprep.mubr.f32.mxu1 %v3357_v23  ;;  %v880_v30 = vsel %vm871_vm8, %v3358_v15, %v2624_v8 }
 0x2af   :  { %v976_v17 = vsel %vm975_vm5, %v3305_v57, %v2671_v43  ;;  %v988_v18 = vsel %vm975_vm5, %v2671_v43, %v3307_v62  ;;  %v923_v7 = vmul.f32 %v3348_v56, %v883_v47  ;;  %1341 = vmatpush2.msra.mxu0 %v2760_v12  ;;  %v915_v22 = vmul.f32 %v3348_v56, %v881_v21 }
 0x2b0   :  { %v2951_v1 = vpop.permute.xlu1 %737  ;;  %v874_v8 = vsel %vm871_vm8, %v3341_v27, %v2742_v29  ;;  %v886_v57 = vsel %vm871_vm8, %v2742_v29, %v3343_v41  ;;  %1342 = vmatprep.subr.mxu0 %v924_v11  ;;  %1476 = vmatprep.subr.mxu1 %v1030_v44  ;;  %v750_v43 = vpop.permute.xlu0 %749  ;;  %v1021_v62 = vmul.f32 %v3350_v28, %v977_v5  ;;  %v3359_v5 = vld [vmem:[#allocation100_spill] sm:$0xff] }
 0x2b1   :  { %v1022_v12 = vmul.f32 %v3352_v0, %v989_v34  ;;  %v912_v52 = vmul.f32 %v3338_v31, %v876_v26  ;;  %1343 = vmatpush2.msra.mxu0 %v923_v7  ;;  %1477 = vmatpush2.msra.mxu1 %v1029_v25  ;;  %v911_v27 = vmul.f32 %v3348_v56, %v880_v30 }
 0x2b2   :  { %v1017_v21 = vmul.f32 %v3350_v28, %v976_v17  ;;  %v1018_v47 = vmul.f32 %v3352_v0, %v988_v18  ;;  %1344 = vmatprep.subr.mxu0 %v920_v53  ;;  %1478 = vmatprep.subr.mxu1 %v1026_v48  ;;  %v921_v29 = vmul.f32 %v2790_v55, %v874_v8 }
 0x2b3   :  { %v922_v41 = vmul.f32 %v2799_v19, %v886_v57  ;;  %v775_v31 = vsel %vm767_vm9, %v750_v43, %v3359_v5  ;;  %1345 = vmatpush2.msra.mxu0 %v919_v39  ;;  %1479 = vmatpush2.msra.mxu1 %v1025_v35  ;;  %v873_v56 = vsel %vm871_vm8, %v3332_v51, %v2810_v10 }
 0x2b4   :  { %v2974_v34 = vpop.permute.xlu1 %751  ;;  %v774_v53 = vsel %vm767_vm9, %v2707_v24, %v2840_v36  ;;  %v779_v28 = vsel %vm767_vm9, %v2767_v37, %v750_v43  ;;  %1346 = vmatprep.subr.mxu0 %v2852_v38  ;;  %1480 = vmatprep.subr.mxu1 %v1022_v12  ;;  %v870_v39 = vpop.permute.xlu0 %869  ;;  %v778_v35 = vsel %vm767_vm9, %v2875_v46, %v2707_v24  ;;  %v3360_v12 = vld [vmem:[#allocation29_spill] sm:$0xff] }
 0x2b5   :  { %1347 = vmatpush2.msra.mxu0 %v915_v22  ;;  %v875_v51 = vsel %vm871_vm8, %v3354_v33, %v870_v39  ;;  %v887_v0 = vsel %vm871_vm8, %v870_v39, %v3355_v61  ;;  %1481 = vmatpush2.msra.mxu1 %v1021_v62  ;;  %v820_v48 = vmul.f32 %v2880_v42, %v775_v31  ;;  %v3363_v31 = vld [vmem:[#allocation19_spill] sm:$0xff] }
 0x2b6   :  { %v925_v38 = vmul.f32 %v2790_v55, %v875_v51  ;;  %v926_v13 = vmul.f32 %v2799_v19, %v887_v0  ;;  %1348 = vmatprep.subr.mxu0 %v912_v52  ;;  %1482 = vmatprep.subr.mxu1 %v1018_v47  ;;  %v885_v24 = vsel %vm871_vm8, %v2810_v10, %v3353_v3  ;;  %v3362_v47 = vld [vmem:[#allocation24_spill] sm:$0xff]  ;;  %v3365_v39 = vld [vmem:[#allocation15_spill] sm:$0xff] }
 0x2b7   :  { %v773_v33 = vsel %vm767_vm9, %v2774_v14, %v2907_v63  ;;  %v819_v61 = vmul.f32 %v2883_v32, %v779_v28  ;;  %1349 = vmatpush2.msra.mxu0 %v911_v27  ;;  %1483 = vmatpush2.msra.mxu1 %v1017_v21  ;;  %v816_v54 = vmul.f32 %v2880_v42, %v774_v53  ;;  %v3366_v51 = vld [vmem:[#allocation51_spill] sm:$0xff] }
 0x2b8   :  { %v736_v26 = vpop.permute.xlu1 %735  ;;  %v815_v58 = vmul.f32 %v2883_v32, %v778_v35  ;;  %v777_v11 = vsel %vm767_vm9, %v2951_v1, %v2774_v14  ;;  %1350 = vmatprep.subr.mxu0 %v820_v48  ;;  %1484 = vmatprep.subr.mxu1 %v926_v13  ;;  %v864_v10 = vpop.permute.xlu0 %863  ;;  %v772_v3 = vsel %vm767_vm9, %v2848_v2, %v2974_v34  ;;  %v3367_v48 = vld [vmem:[#allocation13_spill] sm:$0xff]  ;;  %v1151_v13 = vld [vmem:[#allocation3] sm:$0xff] }
 0x2b9   :  { %v776_v25 = vsel %vm767_vm9, %v736_v26, %v2848_v2  ;;  %1351 = vmatpush2.msra.mxu0 %v819_v61  ;;  %v872_v44 = vsel %vm871_vm8, %v3356_v16, %v864_v10  ;;  %1485 = vmatpush2.msra.mxu1 %v925_v38  ;;  %v918_v14 = vmul.f32 %v2799_v19, %v885_v24  ;;  %v3368_v38 = vld [vmem:[#allocation74_spill] sm:$0xff]  ;;  %v3369_v24 = vld [vmem:[#allocation52_spill] sm:$0xff] }
 0x2ba   :  { %v812_v23 = vmul.f32 %v2880_v42, %v773_v33  ;;  %v884_v30 = vsel %vm871_vm8, %v864_v10, %v3358_v15  ;;  %1352 = vmatprep.subr.mxu0 %v816_v54  ;;  %1486 = vmatprep.subr.mxu1 %v922_v41  ;;  %v917_v17 = vmul.f32 %v2790_v55, %v873_v56  ;;  %v3364_v56 = vld [vmem:[#allocation17_spill] sm:$0xff]  ;;  %v3370_v33 = vld [vmem:[#allocation75_spill] sm:$0xff] }
 0x2bb   :  { %v811_v2 = vmul.f32 %v2883_v32, %v777_v11  ;;  %1353 = vmatpush2.msra.mxu0 %v815_v58  ;;  %1487 = vmatpush2.msra.mxu1 %v921_v29  ;;  %v808_v16 = vmul.f32 %v2880_v42, %v772_v3  ;;  %v807_v7 = vmul.f32 %v2883_v32, %v776_v25  ;;  %v3372_v58 = vld [vmem:[#allocation9_spill] sm:$0xff] }
 0x2bc   :  { %v764_v18 = vpop.permute.xlu1 %763  ;;  %v913_v22 = vmul.f32 %v2790_v55, %v872_v44  ;;  %1354 = vmatprep.subr.mxu0 %v812_v23  ;;  %1488 = vmatprep.subr.mxu1 %v918_v14  ;;  %v766_v8 = vpop.permute.xlu0 %765  ;;  %v914_v15 = vmul.f32 %v2799_v19, %v884_v30  ;;  %v3373_v44 = vld [vmem:[#allocation37_spill] sm:$0xff] }
 0x2bd   :  { %v770_v57 = vsel %vm767_vm9, %v2840_v36, %v764_v18  ;;  %1355 = vmatpush2.msra.mxu0 %v811_v2  ;;  %v771_v43 = vsel %vm767_vm9, %v3359_v5, %v766_v8  ;;  %v783_v42 = vsel %vm767_vm9, %v766_v8, %v2767_v37  ;;  %v782_v55 = vsel %vm767_vm9, %v764_v18, %v2875_v46  ;;  %v3361_v37 = vld [vmem:[#allocation88_spill] sm:$0xff]  ;;  %v3374_v2 = vld [vmem:[#allocation25_spill] sm:$0xff]  ;;  %v3378_v8 = vld [vmem:[#allocation14_spill] sm:$0xff] }
 0x2be   :  { %v821_v32 = vmul.f32 %v2888_v20, %v771_v43  ;;  %v822_v19 = vmul.f32 %v2891_v49, %v783_v42  ;;  %1356 = vmatprep.subr.mxu0 %v808_v16  ;;  %1489 = vmatpush2.msra.mxu1 %v917_v17  ;;  %v817_v62 = vmul.f32 %v2888_v20, %v770_v57 }
 0x2bf   :  { %1357 = vmatpush2.msra.mxu0 %v807_v7  ;;  %1490 = vmatprep.subr.mxu1 %v914_v15  ;;  %v1110_v27 = vrot.slane %v3361_v37, %v2359_v4  ;;  %v818_v46 = vmul.f32 %v2891_v49, %v782_v55  ;;  %v3375_v7 = vld [vmem:[#allocation20_spill] sm:$0xff] }
 0x2c0   :  { %v760_v36 = vpop.permute.xlu1 %759  ;;  %1358 = vmatprep.subr.mxu0 %v3360_v12  ;;  %1491 = vmatpush2.msra.mxu1 %v913_v22  ;;  %v762_v52 = vpop.permute.xlu0 %761  ;;  %v3377_v22 = vld [vmem:[#allocation16_spill] sm:$0xff] }
 0x2c1   :  { %v768_v21 = vsel %vm767_vm9, %v2974_v34, %v760_v36  ;;  %1359 = vmatpush2.msra.mxu0 %v3362_v47  ;;  %1492 = vmatprep.subr.mxu1 %v822_v19  ;;  %v769_v29 = vsel %vm767_vm9, %v2907_v63, %v762_v52  ;;  %v780_v41 = vsel %vm767_vm9, %v760_v36, %v736_v26  ;;  %v3371_v26 = vld [vmem:[#allocation11_spill] sm:$0xff]  ;;  %v3379_v15 = vld [vmem:[#allocation12_spill] sm:$0xff] }
 0x2c2   :  { %v781_v4 = vsel %vm767_vm9, %v762_v52, %v2951_v1  ;;  %v813_v5 = vmul.f32 %v2888_v20, %v769_v29  ;;  %1360 = vmatprep.subr.mxu0 %v3363_v31  ;;  %1493 = vmatpush2.msra.mxu1 %v821_v32  ;;  %v1114_v63 = vrot.slane %v3361_v37, %v2366_v50 }
 0x2c3   :  { %v814_v34 = vmul.f32 %v2891_v49, %v781_v4  ;;  %1361 = vmatpush2.msra.mxu0 %v3364_v56  ;;  %1494 = vmatprep.subr.mxu1 %v818_v46  ;;  %v809_v28 = vmul.f32 %v2888_v20, %v768_v21  ;;  %v810_v35 = vmul.f32 %v2891_v49, %v780_v41 }
 0x2c4   :  { %v1076_v53 = vpop.permute.xlu1 %1075  ;;  %1362 = vmatprep.subr.mxu0 %v3365_v39  ;;  %1495 = vmatpush2.msra.mxu1 %v817_v62  ;;  %v1078_v1 = vpop.permute.xlu0 %1077 }
 0x2c5   :  { %v1082_v0 = vsel %vm1079_vm6, %v3366_v51, %v1076_v53  ;;  %1363 = vmatpush2.msra.mxu0 %v3367_v48  ;;  %1496 = vmatprep.subr.mxu1 %v814_v34  ;;  %v1083_v50 = vsel %vm1079_vm6, %v3368_v38, %v1078_v1  ;;  %v1094_v20 = vsel %vm1079_vm6, %v1076_v53, %v3369_v24 }
 0x2c6   :  { %v1095_v49 = vsel %vm1079_vm6, %v1078_v1, %v3370_v33  ;;  %v1133_v61 = vmul.f32 %v1110_v27, %v1083_v50  ;;  %1364 = vmatprep.subr.mxu0 %v3371_v26  ;;  %1497 = vmatpush2.msra.mxu1 %v813_v5  ;;  %v1129_v3 = vmul.f32 %v1110_v27, %v1082_v0 }
 0x2c7   :  { %v1134_v54 = vmul.f32 %v1114_v63, %v1095_v49  ;;  %1365 = vmatpush2.msra.mxu0 %v3372_v58  ;;  %1498 = vmatprep.subr.mxu1 %v810_v35  ;;  %v1130_v25 = vmul.f32 %v1114_v63, %v1094_v20 }
 0x2c8   :  { %v1072_v11 = vpop.permute.xlu1 %1071  ;;  %1367 = vmatmul.mubr.f32.vlgmr.msra.gmra.mxu0 %v1151_v13  ;;  %1499 = vmatpush2.msra.mxu1 %v809_v28  ;;  %v1074_v10 = vpop.permute.xlu0 %1073 }
 0x2c9   :  { %1500 = vmatprep.subr.mxu1 %v3373_v44  ;;  %1539 = vmatprep.subr.mxu0 %v1134_v54  ;;  %v1081_v14 = vsel %vm1079_vm6, %v2037_v40, %v1074_v10  ;;  %v1092_v23 = vsel %vm1079_vm6, %v1072_v11, %v1950_v9  ;;  %v1093_v30 = vsel %vm1079_vm6, %v1074_v10, %v2047_v45  ;;  %v3376_v40 = vld [vmem:[#allocation18_spill] sm:$0xff] }
 0x2ca   :  { %v1125_v17 = vmul.f32 %v1110_v27, %v1081_v14  ;;  %1501 = vmatpush2.msra.mxu1 %v3374_v2  ;;  %1540 = vmatpush1.msra.mxu0 %v1133_v61  ;;  %v1080_v18 = vsel %vm1079_vm6, %v1940_v6, %v1072_v11  ;;  %v1126_v16 = vmul.f32 %v1114_v63, %v1093_v30  ;;  %v3381_v6 = vmov 0.0  }
 0x2cb   :  { %1502 = vmatprep.subr.mxu1 %v3375_v7  ;;  %1541 = vmatprep.subr.mxu0 %v1130_v25  ;;  %v1122_v9 = vmul.f32 %v1114_v63, %v1092_v23  ;;  %v1121_v45 = vmul.f32 %v1110_v27, %v1080_v18 }
 0x2cc   :  { %1503 = vmatpush2.msra.mxu1 %v3376_v40  ;;  %1542 = vmatpush1.msra.mxu0 %v1129_v3 }
 0x2cd   :  { %1504 = vmatprep.subr.mxu1 %v3377_v22  ;;  %1543 = vmatprep.subr.mxu0 %v1126_v16 }
 0x2ce   :  { %1505 = vmatpush2.msra.mxu1 %v3378_v8  ;;  %1544 = vmatpush1.msra.mxu0 %v1125_v17 }
 0x2cf   :  { %1506 = vmatprep.subr.mxu1 %v3379_v15  ;;  %1545 = vmatprep.subr.mxu0 %v1122_v9 }
 0x2d0   :  { %1507 = vmatpush2.msra.mxu1 %v3380_v59  ;;  %1546 = vmatpush1.msra.mxu0 %v1121_v45 }
 0x2d1   :  { %1579 = vmatprep.mubr.f32.mxu0 %v3381_v6  ;;  %1509 = vmatmul.mubr.f32.vlgmr.msra.gmra.mxu1 %v1151_v13 }
 0x2d2   :  { %1621 = vmatmul.mubr.msk.f32.vlgmr.msra.gmra.mxu0 %vm1298_vm7, %v2626_v60 }
 0x34e   :  { %v1439_v57 = vpop.f32.mrf.mxu1 }
 0x350   :  { %v1441_v55 = vpop.f32.mrf.mxu1 }
 0x388   :  { %v1368_v43 = vpop.f32.mrf.mxu0 }
 0x389   :  { %v1440_v42 = vadd.f32 %v1439_v57, %v1368_v43 }
 0x38a   :  { %v1370_v32 = vpop.f32.mrf.mxu0 }
 0x38b   :  { %1586 = vst [vmem:[#allocation6] sm:$0xff] %v1440_v42  ;;  %v1442_v19 = vadd.f32 %v1441_v55, %v1370_v32 }
 0x38d   :  { %1587 = vst [vmem:[#allocation6 + $0x8] sm:$0xff] %v1442_v19 }
 0x391   :  { %v1510_v36 = vpop.f32.mrf.mxu1 }
 0x392   :  { %v1581_v62 = vpop.f32.mrf.mxu0 }
 0x393   :  { %v1582_v12 = vadd.f32 %v1581_v62, %v1510_v36  ;;  %v1512_v52 = vpop.f32.mrf.mxu1 }
 0x394   :  { %v1583_v37 = vpop.f32.mrf.mxu0 }
 0x395   :  { %1588 = vst [vmem:[#allocation6 + $0x10] sm:$0xff] %v1582_v12  ;;  %v1584_v27 = vadd.f32 %v1583_v37, %v1512_v52 }
 0x397   :  { %1589 = vst [vmem:[#allocation6 + $0x18] sm:$0xff] %v1584_v27 }
 0x398   :  { %1667 = shalt.err (!%p1664_p9)
}
 0x399   :  { %1599 = dma.vmem_to_hbm [thread:$0]  %s1597_s24, 512, %s3125_s7, [#allocation5]  }
 0x39a   :  { %1678 = dma.done.wait [#allocation5], 512  }
 0x39b   :  { %1679 = vsyncadd [#allocation5], 4294966784 }
 0x39c   :  { %1603 = vsyncpa [#allocation4], 1 }
 0x39d   :  { %1604 = vsyncpa [#allocation5], 1 }

</bundles_post_ra>
